<compile_context>
chip_gen: v7x
topology: tpu7x:2x2x1
jax: 0.10.0
libtpu: 0.0.40
codegen_flags: <defaults>
</compile_context>

<pallas_src>
import functools

import jax
import jax.numpy as jnp
import numpy as np
from jax.experimental import pallas as pl
from jax.experimental.pallas import tpu as pltpu

# ----------------------------- model hyper-parameters -----------------------------
BATCH = 2
SEQ_LEN = 16          # must be divisible by 4 (two MaxPool1d(2) stages)
INPUT_SIZE = 4
HIDDEN_SIZE = 32
NUM_LAYERS = 2
OUTPUT_SIZE = 3
CONV1_OUT = 64
CONV2_OUT = 128
FC1_OUT = 64
OUT_PAD = 128         # lane-dense padded output width (sliced back to OUTPUT_SIZE)
H4 = 4 * HIDDEN_SIZE  # 128

# ------------------------- packed-parameter slab layouts ---------------------------
# slab "w128": every 128-lane-wide weight matrix, stacked along sublanes (rows = K dim)
W128_C2W = (0, 192)       # fused conv2 taps  [w_k0; w_k1; w_k2]       (3*64, 128)
W128_L0WIH = (192, 320)   # LSTM layer-0 W_ih (gate-scaled)            (128, 128)
W128_L0WHH = (320, 352)   # LSTM layer-0 W_hh (gate-scaled)            (32, 128)
W128_L1CAT = (352, 416)   # LSTM layer-1 [W_ih; W_hh] (gate-scaled)    (64, 128)
W128_FC2W = (416, 480)    # fc2 weight zero-padded to 128 lanes        (64, 128)
W128_ROWS = 480

# slab "w64": 64-lane-wide weights
W64_C1W = (0, 12)         # fused conv1 taps  [w_k0; w_k1; w_k2]       (3*4, 64)
W64_FC1W = (16, 48)       # fc1 weight                                 (32, 64)
W64_ROWS = 48


def _round8(n):
    return ((n + 7) // 8) * 8


def _misc_layout(batch, seq_len):
    """Row layout of the "misc" slab: biases, pool-selection matrices, boundary masks."""
    L1, L2, T = seq_len, seq_len // 2, seq_len // 4
    lay = {"c1_b": 0, "c2_b": 1, "l0_b": 2, "l1_b": 3, "fc1_b": 4, "fc2_b": 5}
    r = 8
    lay["sel1"] = (r, r + batch * L2)
    r += _round8(batch * L2)
    lay["sel2"] = (r, r + batch * T)
    r += _round8(batch * T)
    lay["mask1"] = (r, r + batch * L1)
    r += _round8(batch * L1)
    lay["mask2"] = (r, r + batch * L2)
    r += _round8(batch * L2)
    lay["rows"] = r
    return lay


# ----------------------------------- kernel ---------------------------------------
def aqi_kernel(x_ref, w128_ref, w64_ref, misc_ref, out_ref, *, batch, seq_len):
    f32 = jnp.float32
    dot = functools.partial(jnp.dot, preferred_element_type=f32)
    B, H = batch, HIDDEN_SIZE
    L1, L2, T = seq_len, seq_len // 2, seq_len // 4
    lay = _misc_layout(B, L1)

    # --- only in-kernel constant: lane mask selecting the "g" (cell-candidate) gate ---
    lane = jax.lax.broadcasted_iota(jnp.int32, (B, H4), 1)
    g_gate_mask = (lane >= 2 * H) & (lane < 3 * H)

    # --- host-precomputed pool selectors & segment-boundary masks (misc slab) ---------
    sel1 = misc_ref[lay["sel1"][0]:lay["sel1"][1], 0:B * L1]      # (B*L2, B*L1) batch-major
    sel2 = misc_ref[lay["sel2"][0]:lay["sel2"][1], 0:B * L2]      # (B*T,  B*L2) time-major
    nf1 = misc_ref[lay["mask1"][0]:lay["mask1"][1], 0:1]          # 0 at first row of a segment
    nl1 = misc_ref[lay["mask1"][0]:lay["mask1"][1], 1:2]          # 0 at last  row of a segment
    nf2 = misc_ref[lay["mask2"][0]:lay["mask2"][1], 0:1]
    nl2 = misc_ref[lay["mask2"][0]:lay["mask2"][1], 1:2]

    def conv_relu_pool(h, w, b, nf, nl, sel):
        """Conv1d(k=3, pad=1) + ReLU + MaxPool1d(2) on batch-folded rows, one MXU matmul."""
        n = h.shape[0]
        h_m1 = pltpu.roll(h, shift=1, axis=0) * nf        # h[l-1], zeroed at segment start
        h_p1 = pltpu.roll(h, shift=n - 1, axis=0) * nl    # h[l+1], zeroed at segment end
        cat = jnp.concatenate([h_m1, h, h_p1], axis=1)    # (n, 3*C_in) lane-concatenated taps
        y = jnp.maximum(dot(cat, w) + b, 0.0)
        y = jnp.maximum(y, pltpu.roll(y, shift=n - 1, axis=0))   # pair max: max(y[l], y[l+1])
        return dot(sel, y)                                # even-row (and reorder) selection

    # ------------------------------ conv stages ----------------------------------------
    x = x_ref[...].astype(f32)                                                  # (B*L1, 4)
    h = conv_relu_pool(x, w64_ref[W64_C1W[0]:W64_C1W[1], :],
                       misc_ref[lay["c1_b"]:lay["c1_b"] + 1, 0:CONV1_OUT],
                       nf1, nl1, sel1)                                          # (B*L2, 64)
    # TODO(synk): on v5e split the fused K=192 conv2 matmul as K=128 + K=64 so both 128-wide
    # MXU passes stay fully packed (neutral on v6e/v7x).
    h = conv_relu_pool(h, w128_ref[W128_C2W[0]:W128_C2W[1], :],
                       misc_ref[lay["c2_b"]:lay["c2_b"] + 1, :],
                       nf2, nl2, sel2)                                          # (T*B, 128) time-major
    # nn.Dropout(0.5): identity at inference time (no RNG mask applied).

    # ------------------------------ 2-layer LSTM ----------------------------------------
    # i/f/o gate columns of all LSTM weights & biases are pre-scaled by 0.5 host-side so a
    # single tanh over the full (B, 4H) vreg yields every gate: sigmoid(z) = 0.5*(1+tanh(z/2)).
    w0hh = w128_ref[W128_L0WHH[0]:W128_L0WHH[1], :]                             # (H, 4H)
    w1cat = w128_ref[W128_L1CAT[0]:W128_L1CAT[1], :]                            # (2H, 4H)
    b1 = jnp.broadcast_to(misc_ref[lay["l1_b"]:lay["l1_b"] + 1, :], (B, H4))    # hoisted broadcast

    # layer-0 input projection + bias hoisted off the recurrence as ONE matmul
    xp0 = (dot(h, w128_ref[W128_L0WIH[0]:W128_L0WIH[1], :])
           + misc_ref[lay["l0_b"]:lay["l0_b"] + 1, :])                          # (T*B, 4H)

    def gate_step(g, c_prev):
        t = jnp.tanh(g)                                    # single EUP launch per gate stage
        act = jnp.where(g_gate_mask, t, 0.5 * (t + 1.0))   # i/f/o: sigmoid(z); g: tanh(z)
        c = act[:, H:2 * H] * c_prev + act[:, 0:H] * act[:, 2 * H:3 * H]
        return act[:, 3 * H:4 * H] * jnp.tanh(c), c

    zeros = jnp.zeros((B, H), f32)
    h0, c0, h1, c1 = zeros, zeros, zeros, zeros
    # Interleaved emission: layer-1 step t needs only layer-0 step t and layer-1 step t-1,
    # and its input projection is folded into the recurrence matmul, so the data critical
    # path is ~T+1 recurrence steps instead of 2T.
    for t in range(T):
        g0 = xp0[t * B:(t + 1) * B, :] + dot(h0, w0hh)
        h0, c0 = gate_step(g0, c0)
        g1 = dot(jnp.concatenate([h0, h1], axis=1), w1cat) + b1
        h1, c1 = gate_step(g1, c1)

    # -------------------------------- FC head -------------------------------------------
    z = jnp.maximum(dot(h1, w64_ref[W64_FC1W[0]:W64_FC1W[1], :])
                    + misc_ref[lay["fc1_b"]:lay["fc1_b"] + 1, 0:FC1_OUT], 0.0)   # (B, 64)
    out = (dot(z, w128_ref[W128_FC2W[0]:W128_FC2W[1], :])
           + misc_ref[lay["fc2_b"]:lay["fc2_b"] + 1, :])                         # (B, 128) lane-dense
    out_ref[...] = out.astype(out_ref.dtype)


# ---------------------------- host-side parameter packing --------------------------
def _pack_params(params, batch, seq_len):
    """Pack all parameters + constant selectors/masks into 3 lane-dense f32 slabs."""
    H = HIDDEN_SIZE
    L1, L2, T = seq_len, seq_len // 2, seq_len // 4
    out_size = params["fc2_w"].shape[1]

    # sigmoid(z) = 0.5*(1 + tanh(z/2)): pre-scale i/f/o gate columns by 0.5 (g columns stay 1)
    gscale = np.full((H4,), 0.5, np.float32)
    gscale[2 * H:3 * H] = 1.0

    p = {k: np.asarray(v, np.float32) for k, v in params.items()}

    w128 = np.zeros((W128_ROWS, 128), np.float32)
    w128[W128_C2W[0]:W128_C2W[1], :] = p["c2_w"].reshape(3 * CONV1_OUT, CONV2_OUT)
    w128[W128_L0WIH[0]:W128_L0WIH[1], :] = p["l0_wih"] * gscale
    w128[W128_L0WHH[0]:W128_L0WHH[1], :] = p["l0_whh"] * gscale
    w128[W128_L1CAT[0]:W128_L1CAT[1], :] = (
        np.concatenate([p["l1_wih"], p["l1_whh"]], axis=0) * gscale)
    w128[W128_FC2W[0]:W128_FC2W[1], 0:out_size] = p["fc2_w"]

    w64 = np.zeros((W64_ROWS, 64), np.float32)
    w64[W64_C1W[0]:W64_C1W[1], :] = p["c1_w"].reshape(3 * INPUT_SIZE, CONV1_OUT)
    w64[W64_FC1W[0]:W64_FC1W[1], :] = p["fc1_w"]

    lay = _misc_layout(batch, seq_len)
    misc = np.zeros((lay["rows"], 128), np.float32)
    misc[lay["c1_b"], 0:CONV1_OUT] = p["c1_b"].reshape(-1)
    misc[lay["c2_b"], 0:CONV2_OUT] = p["c2_b"].reshape(-1)
    misc[lay["l0_b"], 0:H4] = p["l0_b"].reshape(-1) * gscale
    misc[lay["l1_b"], 0:H4] = p["l1_b"].reshape(-1) * gscale
    misc[lay["fc1_b"], 0:FC1_OUT] = p["fc1_b"].reshape(-1)
    misc[lay["fc2_b"], 0:out_size] = p["fc2_b"].reshape(-1)
    # pool1 selection: output row b*L2 + j  <-  pair-maxed row b*L1 + 2*j   (batch-major)
    for b in range(batch):
        for j in range(L2):
            misc[lay["sel1"][0] + b * L2 + j, b * L1 + 2 * j] = 1.0
    # pool2 selection + permute: output row t*B + b  <-  row b*L2 + 2*t     (time-major)
    for t in range(T):
        for b in range(batch):
            misc[lay["sel2"][0] + t * batch + b, b * L2 + 2 * t] = 1.0
    # segment-boundary masks: col 0 zeroes h[l-1] at l == 0, col 1 zeroes h[l+1] at l == L-1
    misc[lay["mask1"][0]:lay["mask1"][0] + batch * L1, 0:2] = 1.0
    misc[lay["mask2"][0]:lay["mask2"][0] + batch * L2, 0:2] = 1.0
    for b in range(batch):
        misc[lay["mask1"][0] + b * L1, 0] = 0.0
        misc[lay["mask1"][0] + b * L1 + L1 - 1, 1] = 0.0
        misc[lay["mask2"][0] + b * L2, 0] = 0.0
        misc[lay["mask2"][0] + b * L2 + L2 - 1, 1] = 0.0

    return jnp.asarray(w128), jnp.asarray(w64), jnp.asarray(misc)


# ---------------------------------- wrapper ----------------------------------------
def aqi_cnn_lstm_forward(x, params):
    B, L, C_in = x.shape
    assert L % 4 == 0, "seq_len must be divisible by 4"
    assert C_in == INPUT_SIZE and params["l0_whh"].shape[0] == HIDDEN_SIZE
    out_size = params["fc2_w"].shape[1]

    x2d = jnp.asarray(x, jnp.float32).reshape(B * L, C_in)   # fold batch into matmul rows
    w128, w64, misc = _pack_params(params, B, L)

    def vmem_spec(shape):
        return pl.BlockSpec(shape, lambda *_, nd=len(shape): (0,) * nd)

    out = pl.pallas_call(
        functools.partial(aqi_kernel, batch=B, seq_len=L),
        out_shape=jax.ShapeDtypeStruct((B, OUT_PAD), jnp.float32),
        in_specs=[vmem_spec(a.shape) for a in (x2d, w128, w64, misc)],
        out_specs=vmem_spec((B, OUT_PAD)),
    )(x2d, w128, w64, misc)
    return out[:, :out_size]


# ------------------------------ pure-JAX reference ---------------------------------
def reference_forward(x, p):
    hi = jax.lax.Precision.HIGHEST

    def conv_block(h, w, b):
        B, L, _ = h.shape
        hp = jnp.pad(h, ((0, 0), (1, 1), (0, 0)))
        y = (jnp.einsum("blc,cd->bld", hp[:, 0:L, :], w[0], precision=hi)
             + jnp.einsum("blc,cd->bld", hp[:, 1:L + 1, :], w[1], precision=hi)
             + jnp.einsum("blc,cd->bld", hp[:, 2:L + 2, :], w[2], precision=hi) + b)
        y = jnp.maximum(y, 0.0)
        return jnp.max(y.reshape(B, L // 2, 2, -1), axis=2)

    h = conv_block(x, p["c1_w"], p["c1_b"])
    h = conv_block(h, p["c2_w"], p["c2_b"])
    B, T, _ = h.shape
    H = p["l0_whh"].shape[0]

    def lstm(seq, wih, whh, b):
        hs = jnp.zeros((B, H), jnp.float32)
        cs = jnp.zeros((B, H), jnp.float32)
        outs = []
        for t in range(T):
            g = (jnp.dot(seq[:, t, :], wih, precision=hi)
                 + jnp.dot(hs, whh, precision=hi) + b)
            i = jax.nn.sigmoid(g[:, :H])
            f = jax.nn.sigmoid(g[:, H:2 * H])
            gg = jnp.tanh(g[:, 2 * H:3 * H])
            o = jax.nn.sigmoid(g[:, 3 * H:])
            cs = f * cs + i * gg
            hs = o * jnp.tanh(cs)
            outs.append(hs)
        return jnp.stack(outs, axis=1)

    s = lstm(h, p["l0_wih"], p["l0_whh"], p["l0_b"])
    s = lstm(s, p["l1_wih"], p["l1_whh"], p["l1_b"])
    last = s[:, -1, :]
    z = jnp.maximum(jnp.dot(last, p["fc1_w"], precision=hi) + p["fc1_b"], 0.0)
    return jnp.dot(z, p["fc2_w"], precision=hi) + p["fc2_b"]


# --------------------------------- param init --------------------------------------
def init_params(key):
    ks = jax.random.split(key, 16)
    n = lambda k, shape, scale=0.1: (scale * jax.random.normal(k, shape)).astype(jnp.float32)
    return {
        "c1_w": n(ks[0], (3, INPUT_SIZE, CONV1_OUT)),
        "c1_b": n(ks[1], (1, CONV1_OUT)),
        "c2_w": n(ks[2], (3, CONV1_OUT, CONV2_OUT)),
        "c2_b": n(ks[3], (1, CONV2_OUT)),
        "l0_wih": n(ks[4], (CONV2_OUT, H4)),
        "l0_whh": n(ks[5], (HIDDEN_SIZE, H4)),
        "l0_b": n(ks[6], (1, H4)),          # b_ih + b_hh folded together
        "l1_wih": n(ks[7], (HIDDEN_SIZE, H4)),
        "l1_whh": n(ks[8], (HIDDEN_SIZE, H4)),
        "l1_b": n(ks[9], (1, H4)),
        "fc1_w": n(ks[10], (HIDDEN_SIZE, FC1_OUT)),
        "fc1_b": n(ks[11], (1, FC1_OUT)),
        "fc2_w": n(ks[12], (FC1_OUT, OUTPUT_SIZE)),
        "fc2_b": n(ks[13], (1, OUTPUT_SIZE)),
    }


if __name__ == "__main__":
    key = jax.random.PRNGKey(0)
    kx, kp = jax.random.split(key)
    x = jax.random.normal(kx, (BATCH, SEQ_LEN, INPUT_SIZE), dtype=jnp.float32)
    params = init_params(kp)

    out = jax.block_until_ready(aqi_cnn_lstm_forward(x, params))
    assert out.shape == (BATCH, OUTPUT_SIZE), out.shape

    ref = jax.block_until_ready(reference_forward(x, params))
    max_diff = float(jnp.max(jnp.abs(out - ref)))
    assert max_diff < 2e-3, f"mismatch vs reference: max_diff={max_diff}"

    print("KERNEL_OK")
</pallas_src>

<mosaic_0001>
module attributes {stable_mosaic.version = 11 : i64} {
  func.func @aqi_kernel(%arg0: memref<32x4xf32, #tpu.memory_space<vmem>>, %arg1: memref<480x128xf32, #tpu.memory_space<vmem>>, %arg2: memref<48x64xf32, #tpu.memory_space<vmem>>, %arg3: memref<80x128xf32, #tpu.memory_space<vmem>>, %arg4: memref<2x128xf32, #tpu.memory_space<vmem>>) attributes {dimension_semantics = [], scalar_prefetch = 0 : i64, scratch_operands = 0 : i64, tpu.core_type = #tpu.core_type<tc>} {
    %0 = tpu.iota {dimensions = array<i32: 1>} : vector<2x128xi32>
    %c64_i32 = arith.constant 64 : i32
    %1 = vector.broadcast %c64_i32 : i32 to vector<2x128xi32>
    %2 = arith.cmpi sge, %0, %1 : vector<2x128xi32>
    %c96_i32 = arith.constant 96 : i32
    %3 = vector.broadcast %c96_i32 : i32 to vector<2x128xi32>
    %4 = arith.cmpi slt, %0, %3 : vector<2x128xi32>
    %5 = arith.andi %2, %4 : vector<2x128xi1>
    %c8 = arith.constant 8 : index
    %c0 = arith.constant 0 : index
    %6 = vector.load %arg3[%c8, %c0] : memref<80x128xf32, #tpu.memory_space<vmem>>, vector<16x32xf32>
    %c24 = arith.constant 24 : index
    %c0_0 = arith.constant 0 : index
    %7 = vector.load %arg3[%c24, %c0_0] : memref<80x128xf32, #tpu.memory_space<vmem>>, vector<8x16xf32>
    %c32 = arith.constant 32 : index
    %c0_1 = arith.constant 0 : index
    %8 = vector.load %arg3[%c32, %c0_1] : memref<80x128xf32, #tpu.memory_space<vmem>>, vector<32x1xf32>
    %c32_2 = arith.constant 32 : index
    %c1 = arith.constant 1 : index
    %9 = vector.load %arg3[%c32_2, %c1] : memref<80x128xf32, #tpu.memory_space<vmem>>, vector<32x1xf32>
    %c64 = arith.constant 64 : index
    %c0_3 = arith.constant 0 : index
    %10 = vector.load %arg3[%c64, %c0_3] : memref<80x128xf32, #tpu.memory_space<vmem>>, vector<16x1xf32>
    %c64_4 = arith.constant 64 : index
    %c1_5 = arith.constant 1 : index
    %11 = vector.load %arg3[%c64_4, %c1_5] : memref<80x128xf32, #tpu.memory_space<vmem>>, vector<16x1xf32>
    %c0_6 = arith.constant 0 : index
    %c0_7 = arith.constant 0 : index
    %12 = vector.load %arg0[%c0_6, %c0_7] : memref<32x4xf32, #tpu.memory_space<vmem>>, vector<32x4xf32>
    %c0_8 = arith.constant 0 : index
    %c0_9 = arith.constant 0 : index
    %13 = vector.load %arg2[%c0_8, %c0_9] : memref<48x64xf32, #tpu.memory_space<vmem>>, vector<12x64xf32>
    %c0_10 = arith.constant 0 : index
    %c0_11 = arith.constant 0 : index
    %14 = vector.load %arg3[%c0_10, %c0_11] : memref<80x128xf32, #tpu.memory_space<vmem>>, vector<1x64xf32>
    %c1_i32 = arith.constant 1 : i32
    %15 = tpu.dynamic_rotate %12 by %c1_i32 dim 0 : vector<32x4xf32>, i32 -> vector<32x4xf32>
    %16 = vector.broadcast %8 : vector<32x1xf32> to vector<32x4xf32>
    %17 = arith.mulf %15, %16 : vector<32x4xf32>
    %c31_i32 = arith.constant 31 : i32
    %18 = tpu.dynamic_rotate %12 by %c31_i32 dim 0 : vector<32x4xf32>, i32 -> vector<32x4xf32>
    %19 = vector.broadcast %9 : vector<32x1xf32> to vector<32x4xf32>
    %20 = arith.mulf %18, %19 : vector<32x4xf32>
    %21 = tpu.concatenate %17, %12, %20 in 1 : vector<32x4xf32>, vector<32x4xf32>, vector<32x4xf32> -> vector<32x12xf32>
    %cst = arith.constant dense<0.000000e+00> : vector<32x64xf32>
    %22 = tpu.matmul %21, %13, %cst {dimension_numbers = #tpu.dot_dimension_numbers<[1], [0], [0], [1], [0, 0, 1, 1], [], []>} : vector<32x12xf32>, vector<12x64xf32>, vector<32x64xf32> -> vector<32x64xf32>
    %23 = vector.broadcast %14 : vector<1x64xf32> to vector<32x64xf32>
    %24 = arith.addf %22, %23 : vector<32x64xf32>
    %cst_12 = arith.constant 0.000000e+00 : f32
    %25 = vector.broadcast %cst_12 : f32 to vector<32x64xf32>
    %26 = arith.maximumf %24, %25 : vector<32x64xf32>
    %c31_i32_13 = arith.constant 31 : i32
    %27 = tpu.dynamic_rotate %26 by %c31_i32_13 dim 0 : vector<32x64xf32>, i32 -> vector<32x64xf32>
    %28 = arith.maximumf %26, %27 : vector<32x64xf32>
    %cst_14 = arith.constant dense<0.000000e+00> : vector<16x64xf32>
    %29 = tpu.matmul %6, %28, %cst_14 {dimension_numbers = #tpu.dot_dimension_numbers<[1], [0], [0], [1], [0, 0, 1, 1], [], []>} : vector<16x32xf32>, vector<32x64xf32>, vector<16x64xf32> -> vector<16x64xf32>
    %c0_15 = arith.constant 0 : index
    %c0_16 = arith.constant 0 : index
    %30 = vector.load %arg1[%c0_15, %c0_16] : memref<480x128xf32, #tpu.memory_space<vmem>>, vector<192x128xf32>
    %c1_17 = arith.constant 1 : index
    %c0_18 = arith.constant 0 : index
    %31 = vector.load %arg3[%c1_17, %c0_18] : memref<80x128xf32, #tpu.memory_space<vmem>>, vector<1x128xf32>
    %c1_i32_19 = arith.constant 1 : i32
    %32 = tpu.dynamic_rotate %29 by %c1_i32_19 dim 0 : vector<16x64xf32>, i32 -> vector<16x64xf32>
    %33 = vector.broadcast %10 : vector<16x1xf32> to vector<16x64xf32>
    %34 = arith.mulf %32, %33 : vector<16x64xf32>
    %c15_i32 = arith.constant 15 : i32
    %35 = tpu.dynamic_rotate %29 by %c15_i32 dim 0 : vector<16x64xf32>, i32 -> vector<16x64xf32>
    %36 = vector.broadcast %11 : vector<16x1xf32> to vector<16x64xf32>
    %37 = arith.mulf %35, %36 : vector<16x64xf32>
    %38 = tpu.concatenate %34, %29, %37 in 1 : vector<16x64xf32>, vector<16x64xf32>, vector<16x64xf32> -> vector<16x192xf32>
    %cst_20 = arith.constant dense<0.000000e+00> : vector<16x128xf32>
    %39 = tpu.matmul %38, %30, %cst_20 {dimension_numbers = #tpu.dot_dimension_numbers<[1], [0], [0], [1], [0, 0, 1, 1], [], []>} : vector<16x192xf32>, vector<192x128xf32>, vector<16x128xf32> -> vector<16x128xf32>
    %40 = vector.broadcast %31 : vector<1x128xf32> to vector<16x128xf32>
    %41 = arith.addf %39, %40 : vector<16x128xf32>
    %cst_21 = arith.constant 0.000000e+00 : f32
    %42 = vector.broadcast %cst_21 : f32 to vector<16x128xf32>
    %43 = arith.maximumf %41, %42 : vector<16x128xf32>
    %c15_i32_22 = arith.constant 15 : i32
    %44 = tpu.dynamic_rotate %43 by %c15_i32_22 dim 0 : vector<16x128xf32>, i32 -> vector<16x128xf32>
    %45 = arith.maximumf %43, %44 : vector<16x128xf32>
    %cst_23 = arith.constant dense<0.000000e+00> : vector<8x128xf32>
    %46 = tpu.matmul %7, %45, %cst_23 {dimension_numbers = #tpu.dot_dimension_numbers<[1], [0], [0], [1], [0, 0, 1, 1], [], []>} : vector<8x16xf32>, vector<16x128xf32>, vector<8x128xf32> -> vector<8x128xf32>
    %c320 = arith.constant 320 : index
    %c0_24 = arith.constant 0 : index
    %47 = vector.load %arg1[%c320, %c0_24] : memref<480x128xf32, #tpu.memory_space<vmem>>, vector<32x128xf32>
    %c352 = arith.constant 352 : index
    %c0_25 = arith.constant 0 : index
    %48 = vector.load %arg1[%c352, %c0_25] : memref<480x128xf32, #tpu.memory_space<vmem>>, vector<64x128xf32>
    %c3 = arith.constant 3 : index
    %c0_26 = arith.constant 0 : index
    %49 = vector.load %arg3[%c3, %c0_26] : memref<80x128xf32, #tpu.memory_space<vmem>>, vector<1x128xf32>
    %50 = vector.shape_cast %49 : vector<1x128xf32> to vector<1x128xf32>
    %51 = vector.broadcast %50 : vector<1x128xf32> to vector<2x128xf32>
    %c192 = arith.constant 192 : index
    %c0_27 = arith.constant 0 : index
    %52 = vector.load %arg1[%c192, %c0_27] : memref<480x128xf32, #tpu.memory_space<vmem>>, vector<128x128xf32>
    %cst_28 = arith.constant dense<0.000000e+00> : vector<8x128xf32>
    %53 = tpu.matmul %46, %52, %cst_28 {dimension_numbers = #tpu.dot_dimension_numbers<[1], [0], [0], [1], [0, 0, 1, 1], [], []>} : vector<8x128xf32>, vector<128x128xf32>, vector<8x128xf32> -> vector<8x128xf32>
    %c2 = arith.constant 2 : index
    %c0_29 = arith.constant 0 : index
    %54 = vector.load %arg3[%c2, %c0_29] : memref<80x128xf32, #tpu.memory_space<vmem>>, vector<1x128xf32>
    %55 = vector.broadcast %54 : vector<1x128xf32> to vector<8x128xf32>
    %56 = arith.addf %53, %55 : vector<8x128xf32>
    %cst_30 = arith.constant 0.000000e+00 : f32
    %57 = vector.broadcast %cst_30 : f32 to vector<2x32xf32>
    %58 = vector.extract_strided_slice %56 {offsets = [0, 0], sizes = [2, 128], strides = [1, 1]} : vector<8x128xf32> to vector<2x128xf32>
    %cst_31 = arith.constant dense<0.000000e+00> : vector<2x128xf32>
    %59 = tpu.matmul %57, %47, %cst_31 {dimension_numbers = #tpu.dot_dimension_numbers<[1], [0], [0], [1], [0, 0, 1, 1], [], []>} : vector<2x32xf32>, vector<32x128xf32>, vector<2x128xf32> -> vector<2x128xf32>
    %60 = arith.addf %58, %59 : vector<2x128xf32>
    %61 = math.tanh %60 : vector<2x128xf32>
    %cst_32 = arith.constant 1.000000e+00 : f32
    %62 = vector.broadcast %cst_32 : f32 to vector<2x128xf32>
    %63 = arith.addf %61, %62 : vector<2x128xf32>
    %cst_33 = arith.constant 5.000000e-01 : f32
    %64 = vector.broadcast %cst_33 : f32 to vector<2x128xf32>
    %65 = arith.mulf %64, %63 : vector<2x128xf32>
    %66 = arith.select %5, %61, %65 : vector<2x128xi1>, vector<2x128xf32>
    %67 = vector.extract_strided_slice %66 {offsets = [0, 32], sizes = [2, 32], strides = [1, 1]} : vector<2x128xf32> to vector<2x32xf32>
    %68 = arith.mulf %67, %57 : vector<2x32xf32>
    %69 = vector.extract_strided_slice %66 {offsets = [0, 0], sizes = [2, 32], strides = [1, 1]} : vector<2x128xf32> to vector<2x32xf32>
    %70 = vector.extract_strided_slice %66 {offsets = [0, 64], sizes = [2, 32], strides = [1, 1]} : vector<2x128xf32> to vector<2x32xf32>
    %71 = arith.mulf %69, %70 : vector<2x32xf32>
    %72 = arith.addf %68, %71 : vector<2x32xf32>
    %73 = vector.extract_strided_slice %66 {offsets = [0, 96], sizes = [2, 32], strides = [1, 1]} : vector<2x128xf32> to vector<2x32xf32>
    %74 = math.tanh %72 : vector<2x32xf32>
    %75 = arith.mulf %73, %74 : vector<2x32xf32>
    %76 = tpu.concatenate %75, %57 in 1 : vector<2x32xf32>, vector<2x32xf32> -> vector<2x64xf32>
    %cst_34 = arith.constant dense<0.000000e+00> : vector<2x128xf32>
    %77 = tpu.matmul %76, %48, %cst_34 {dimension_numbers = #tpu.dot_dimension_numbers<[1], [0], [0], [1], [0, 0, 1, 1], [], []>} : vector<2x64xf32>, vector<64x128xf32>, vector<2x128xf32> -> vector<2x128xf32>
    %78 = arith.addf %77, %51 : vector<2x128xf32>
    %79 = math.tanh %78 : vector<2x128xf32>
    %cst_35 = arith.constant 1.000000e+00 : f32
    %80 = vector.broadcast %cst_35 : f32 to vector<2x128xf32>
    %81 = arith.addf %79, %80 : vector<2x128xf32>
    %cst_36 = arith.constant 5.000000e-01 : f32
    %82 = vector.broadcast %cst_36 : f32 to vector<2x128xf32>
    %83 = arith.mulf %82, %81 : vector<2x128xf32>
    %84 = arith.select %5, %79, %83 : vector<2x128xi1>, vector<2x128xf32>
    %85 = vector.extract_strided_slice %84 {offsets = [0, 32], sizes = [2, 32], strides = [1, 1]} : vector<2x128xf32> to vector<2x32xf32>
    %86 = arith.mulf %85, %57 : vector<2x32xf32>
    %87 = vector.extract_strided_slice %84 {offsets = [0, 0], sizes = [2, 32], strides = [1, 1]} : vector<2x128xf32> to vector<2x32xf32>
    %88 = vector.extract_strided_slice %84 {offsets = [0, 64], sizes = [2, 32], strides = [1, 1]} : vector<2x128xf32> to vector<2x32xf32>
    %89 = arith.mulf %87, %88 : vector<2x32xf32>
    %90 = arith.addf %86, %89 : vector<2x32xf32>
    %91 = vector.extract_strided_slice %84 {offsets = [0, 96], sizes = [2, 32], strides = [1, 1]} : vector<2x128xf32> to vector<2x32xf32>
    %92 = math.tanh %90 : vector<2x32xf32>
    %93 = arith.mulf %91, %92 : vector<2x32xf32>
    %94 = vector.extract_strided_slice %56 {offsets = [2, 0], sizes = [2, 128], strides = [1, 1]} : vector<8x128xf32> to vector<2x128xf32>
    %cst_37 = arith.constant dense<0.000000e+00> : vector<2x128xf32>
    %95 = tpu.matmul %75, %47, %cst_37 {dimension_numbers = #tpu.dot_dimension_numbers<[1], [0], [0], [1], [0, 0, 1, 1], [], []>} : vector<2x32xf32>, vector<32x128xf32>, vector<2x128xf32> -> vector<2x128xf32>
    %96 = arith.addf %94, %95 : vector<2x128xf32>
    %97 = math.tanh %96 : vector<2x128xf32>
    %cst_38 = arith.constant 1.000000e+00 : f32
    %98 = vector.broadcast %cst_38 : f32 to vector<2x128xf32>
    %99 = arith.addf %97, %98 : vector<2x128xf32>
    %cst_39 = arith.constant 5.000000e-01 : f32
    %100 = vector.broadcast %cst_39 : f32 to vector<2x128xf32>
    %101 = arith.mulf %100, %99 : vector<2x128xf32>
    %102 = arith.select %5, %97, %101 : vector<2x128xi1>, vector<2x128xf32>
    %103 = vector.extract_strided_slice %102 {offsets = [0, 32], sizes = [2, 32], strides = [1, 1]} : vector<2x128xf32> to vector<2x32xf32>
    %104 = arith.mulf %103, %72 : vector<2x32xf32>
    %105 = vector.extract_strided_slice %102 {offsets = [0, 0], sizes = [2, 32], strides = [1, 1]} : vector<2x128xf32> to vector<2x32xf32>
    %106 = vector.extract_strided_slice %102 {offsets = [0, 64], sizes = [2, 32], strides = [1, 1]} : vector<2x128xf32> to vector<2x32xf32>
    %107 = arith.mulf %105, %106 : vector<2x32xf32>
    %108 = arith.addf %104, %107 : vector<2x32xf32>
    %109 = vector.extract_strided_slice %102 {offsets = [0, 96], sizes = [2, 32], strides = [1, 1]} : vector<2x128xf32> to vector<2x32xf32>
    %110 = math.tanh %108 : vector<2x32xf32>
    %111 = arith.mulf %109, %110 : vector<2x32xf32>
    %112 = tpu.concatenate %111, %93 in 1 : vector<2x32xf32>, vector<2x32xf32> -> vector<2x64xf32>
    %cst_40 = arith.constant dense<0.000000e+00> : vector<2x128xf32>
    %113 = tpu.matmul %112, %48, %cst_40 {dimension_numbers = #tpu.dot_dimension_numbers<[1], [0], [0], [1], [0, 0, 1, 1], [], []>} : vector<2x64xf32>, vector<64x128xf32>, vector<2x128xf32> -> vector<2x128xf32>
    %114 = arith.addf %113, %51 : vector<2x128xf32>
    %115 = math.tanh %114 : vector<2x128xf32>
    %cst_41 = arith.constant 1.000000e+00 : f32
    %116 = vector.broadcast %cst_41 : f32 to vector<2x128xf32>
    %117 = arith.addf %115, %116 : vector<2x128xf32>
    %cst_42 = arith.constant 5.000000e-01 : f32
    %118 = vector.broadcast %cst_42 : f32 to vector<2x128xf32>
    %119 = arith.mulf %118, %117 : vector<2x128xf32>
    %120 = arith.select %5, %115, %119 : vector<2x128xi1>, vector<2x128xf32>
    %121 = vector.extract_strided_slice %120 {offsets = [0, 32], sizes = [2, 32], strides = [1, 1]} : vector<2x128xf32> to vector<2x32xf32>
    %122 = arith.mulf %121, %90 : vector<2x32xf32>
    %123 = vector.extract_strided_slice %120 {offsets = [0, 0], sizes = [2, 32], strides = [1, 1]} : vector<2x128xf32> to vector<2x32xf32>
    %124 = vector.extract_strided_slice %120 {offsets = [0, 64], sizes = [2, 32], strides = [1, 1]} : vector<2x128xf32> to vector<2x32xf32>
    %125 = arith.mulf %123, %124 : vector<2x32xf32>
    %126 = arith.addf %122, %125 : vector<2x32xf32>
    %127 = vector.extract_strided_slice %120 {offsets = [0, 96], sizes = [2, 32], strides = [1, 1]} : vector<2x128xf32> to vector<2x32xf32>
    %128 = math.tanh %126 : vector<2x32xf32>
    %129 = arith.mulf %127, %128 : vector<2x32xf32>
    %130 = vector.extract_strided_slice %56 {offsets = [4, 0], sizes = [2, 128], strides = [1, 1]} : vector<8x128xf32> to vector<2x128xf32>
    %cst_43 = arith.constant dense<0.000000e+00> : vector<2x128xf32>
    %131 = tpu.matmul %111, %47, %cst_43 {dimension_numbers = #tpu.dot_dimension_numbers<[1], [0], [0], [1], [0, 0, 1, 1], [], []>} : vector<2x32xf32>, vector<32x128xf32>, vector<2x128xf32> -> vector<2x128xf32>
    %132 = arith.addf %130, %131 : vector<2x128xf32>
    %133 = math.tanh %132 : vector<2x128xf32>
    %cst_44 = arith.constant 1.000000e+00 : f32
    %134 = vector.broadcast %cst_44 : f32 to vector<2x128xf32>
    %135 = arith.addf %133, %134 : vector<2x128xf32>
    %cst_45 = arith.constant 5.000000e-01 : f32
    %136 = vector.broadcast %cst_45 : f32 to vector<2x128xf32>
    %137 = arith.mulf %136, %135 : vector<2x128xf32>
    %138 = arith.select %5, %133, %137 : vector<2x128xi1>, vector<2x128xf32>
    %139 = vector.extract_strided_slice %138 {offsets = [0, 32], sizes = [2, 32], strides = [1, 1]} : vector<2x128xf32> to vector<2x32xf32>
    %140 = arith.mulf %139, %108 : vector<2x32xf32>
    %141 = vector.extract_strided_slice %138 {offsets = [0, 0], sizes = [2, 32], strides = [1, 1]} : vector<2x128xf32> to vector<2x32xf32>
    %142 = vector.extract_strided_slice %138 {offsets = [0, 64], sizes = [2, 32], strides = [1, 1]} : vector<2x128xf32> to vector<2x32xf32>
    %143 = arith.mulf %141, %142 : vector<2x32xf32>
    %144 = arith.addf %140, %143 : vector<2x32xf32>
    %145 = vector.extract_strided_slice %138 {offsets = [0, 96], sizes = [2, 32], strides = [1, 1]} : vector<2x128xf32> to vector<2x32xf32>
    %146 = math.tanh %144 : vector<2x32xf32>
    %147 = arith.mulf %145, %146 : vector<2x32xf32>
    %148 = tpu.concatenate %147, %129 in 1 : vector<2x32xf32>, vector<2x32xf32> -> vector<2x64xf32>
    %cst_46 = arith.constant dense<0.000000e+00> : vector<2x128xf32>
    %149 = tpu.matmul %148, %48, %cst_46 {dimension_numbers = #tpu.dot_dimension_numbers<[1], [0], [0], [1], [0, 0, 1, 1], [], []>} : vector<2x64xf32>, vector<64x128xf32>, vector<2x128xf32> -> vector<2x128xf32>
    %150 = arith.addf %149, %51 : vector<2x128xf32>
    %151 = math.tanh %150 : vector<2x128xf32>
    %cst_47 = arith.constant 1.000000e+00 : f32
    %152 = vector.broadcast %cst_47 : f32 to vector<2x128xf32>
    %153 = arith.addf %151, %152 : vector<2x128xf32>
    %cst_48 = arith.constant 5.000000e-01 : f32
    %154 = vector.broadcast %cst_48 : f32 to vector<2x128xf32>
    %155 = arith.mulf %154, %153 : vector<2x128xf32>
    %156 = arith.select %5, %151, %155 : vector<2x128xi1>, vector<2x128xf32>
    %157 = vector.extract_strided_slice %156 {offsets = [0, 32], sizes = [2, 32], strides = [1, 1]} : vector<2x128xf32> to vector<2x32xf32>
    %158 = arith.mulf %157, %126 : vector<2x32xf32>
    %159 = vector.extract_strided_slice %156 {offsets = [0, 0], sizes = [2, 32], strides = [1, 1]} : vector<2x128xf32> to vector<2x32xf32>
    %160 = vector.extract_strided_slice %156 {offsets = [0, 64], sizes = [2, 32], strides = [1, 1]} : vector<2x128xf32> to vector<2x32xf32>
    %161 = arith.mulf %159, %160 : vector<2x32xf32>
    %162 = arith.addf %158, %161 : vector<2x32xf32>
    %163 = vector.extract_strided_slice %156 {offsets = [0, 96], sizes = [2, 32], strides = [1, 1]} : vector<2x128xf32> to vector<2x32xf32>
    %164 = math.tanh %162 : vector<2x32xf32>
    %165 = arith.mulf %163, %164 : vector<2x32xf32>
    %166 = vector.extract_strided_slice %56 {offsets = [6, 0], sizes = [2, 128], strides = [1, 1]} : vector<8x128xf32> to vector<2x128xf32>
    %cst_49 = arith.constant dense<0.000000e+00> : vector<2x128xf32>
    %167 = tpu.matmul %147, %47, %cst_49 {dimension_numbers = #tpu.dot_dimension_numbers<[1], [0], [0], [1], [0, 0, 1, 1], [], []>} : vector<2x32xf32>, vector<32x128xf32>, vector<2x128xf32> -> vector<2x128xf32>
    %168 = arith.addf %166, %167 : vector<2x128xf32>
    %169 = math.tanh %168 : vector<2x128xf32>
    %cst_50 = arith.constant 1.000000e+00 : f32
    %170 = vector.broadcast %cst_50 : f32 to vector<2x128xf32>
    %171 = arith.addf %169, %170 : vector<2x128xf32>
    %cst_51 = arith.constant 5.000000e-01 : f32
    %172 = vector.broadcast %cst_51 : f32 to vector<2x128xf32>
    %173 = arith.mulf %172, %171 : vector<2x128xf32>
    %174 = arith.select %5, %169, %173 : vector<2x128xi1>, vector<2x128xf32>
    %175 = vector.extract_strided_slice %174 {offsets = [0, 32], sizes = [2, 32], strides = [1, 1]} : vector<2x128xf32> to vector<2x32xf32>
    %176 = arith.mulf %175, %144 : vector<2x32xf32>
    %177 = vector.extract_strided_slice %174 {offsets = [0, 0], sizes = [2, 32], strides = [1, 1]} : vector<2x128xf32> to vector<2x32xf32>
    %178 = vector.extract_strided_slice %174 {offsets = [0, 64], sizes = [2, 32], strides = [1, 1]} : vector<2x128xf32> to vector<2x32xf32>
    %179 = arith.mulf %177, %178 : vector<2x32xf32>
    %180 = arith.addf %176, %179 : vector<2x32xf32>
    %181 = vector.extract_strided_slice %174 {offsets = [0, 96], sizes = [2, 32], strides = [1, 1]} : vector<2x128xf32> to vector<2x32xf32>
    %182 = math.tanh %180 : vector<2x32xf32>
    %183 = arith.mulf %181, %182 : vector<2x32xf32>
    %184 = tpu.concatenate %183, %165 in 1 : vector<2x32xf32>, vector<2x32xf32> -> vector<2x64xf32>
    %cst_52 = arith.constant dense<0.000000e+00> : vector<2x128xf32>
    %185 = tpu.matmul %184, %48, %cst_52 {dimension_numbers = #tpu.dot_dimension_numbers<[1], [0], [0], [1], [0, 0, 1, 1], [], []>} : vector<2x64xf32>, vector<64x128xf32>, vector<2x128xf32> -> vector<2x128xf32>
    %186 = arith.addf %185, %51 : vector<2x128xf32>
    %187 = math.tanh %186 : vector<2x128xf32>
    %cst_53 = arith.constant 1.000000e+00 : f32
    %188 = vector.broadcast %cst_53 : f32 to vector<2x128xf32>
    %189 = arith.addf %187, %188 : vector<2x128xf32>
    %cst_54 = arith.constant 5.000000e-01 : f32
    %190 = vector.broadcast %cst_54 : f32 to vector<2x128xf32>
    %191 = arith.mulf %190, %189 : vector<2x128xf32>
    %192 = arith.select %5, %187, %191 : vector<2x128xi1>, vector<2x128xf32>
    %193 = vector.extract_strided_slice %192 {offsets = [0, 32], sizes = [2, 32], strides = [1, 1]} : vector<2x128xf32> to vector<2x32xf32>
    %194 = arith.mulf %193, %162 : vector<2x32xf32>
    %195 = vector.extract_strided_slice %192 {offsets = [0, 0], sizes = [2, 32], strides = [1, 1]} : vector<2x128xf32> to vector<2x32xf32>
    %196 = vector.extract_strided_slice %192 {offsets = [0, 64], sizes = [2, 32], strides = [1, 1]} : vector<2x128xf32> to vector<2x32xf32>
    %197 = arith.mulf %195, %196 : vector<2x32xf32>
    %198 = arith.addf %194, %197 : vector<2x32xf32>
    %199 = vector.extract_strided_slice %192 {offsets = [0, 96], sizes = [2, 32], strides = [1, 1]} : vector<2x128xf32> to vector<2x32xf32>
    %200 = math.tanh %198 : vector<2x32xf32>
    %201 = arith.mulf %199, %200 : vector<2x32xf32>
    %c16 = arith.constant 16 : index
    %c0_55 = arith.constant 0 : index
    %202 = vector.load %arg2[%c16, %c0_55] : memref<48x64xf32, #tpu.memory_space<vmem>>, vector<32x64xf32>
    %cst_56 = arith.constant dense<0.000000e+00> : vector<2x64xf32>
    %203 = tpu.matmul %201, %202, %cst_56 {dimension_numbers = #tpu.dot_dimension_numbers<[1], [0], [0], [1], [0, 0, 1, 1], [], []>} : vector<2x32xf32>, vector<32x64xf32>, vector<2x64xf32> -> vector<2x64xf32>
    %c4 = arith.constant 4 : index
    %c0_57 = arith.constant 0 : index
    %204 = vector.load %arg3[%c4, %c0_57] : memref<80x128xf32, #tpu.memory_space<vmem>>, vector<1x64xf32>
    %205 = vector.broadcast %204 : vector<1x64xf32> to vector<2x64xf32>
    %206 = arith.addf %203, %205 : vector<2x64xf32>
    %cst_58 = arith.constant 0.000000e+00 : f32
    %207 = vector.broadcast %cst_58 : f32 to vector<2x64xf32>
    %208 = arith.maximumf %206, %207 : vector<2x64xf32>
    %c416 = arith.constant 416 : index
    %c0_59 = arith.constant 0 : index
    %209 = vector.load %arg1[%c416, %c0_59] : memref<480x128xf32, #tpu.memory_space<vmem>>, vector<64x128xf32>
    %cst_60 = arith.constant dense<0.000000e+00> : vector<2x128xf32>
    %210 = tpu.matmul %208, %209, %cst_60 {dimension_numbers = #tpu.dot_dimension_numbers<[1], [0], [0], [1], [0, 0, 1, 1], [], []>} : vector<2x64xf32>, vector<64x128xf32>, vector<2x128xf32> -> vector<2x128xf32>
    %c5 = arith.constant 5 : index
    %c0_61 = arith.constant 0 : index
    %211 = vector.load %arg3[%c5, %c0_61] : memref<80x128xf32, #tpu.memory_space<vmem>>, vector<1x128xf32>
    %212 = vector.broadcast %211 : vector<1x128xf32> to vector<2x128xf32>
    %213 = arith.addf %210, %212 : vector<2x128xf32>
    %c0_62 = arith.constant 0 : index
    %c0_63 = arith.constant 0 : index
    %214 = vector.load %arg4[%c0_62, %c0_63] : memref<2x128xf32, #tpu.memory_space<vmem>>, vector<2x128xf32>
    tpu.vector_store %arg4[%c0_62, %c0_63], %213 {strides = array<i32>} : memref<2x128xf32, #tpu.memory_space<vmem>>, vector<2x128xf32>,
    return
  }
}

</mosaic_0001>

<bundles_post_ra>
// kernel: tpu_custom_call.1
= control target key start
LH: loop header
LB: loop body
LE: loop exit
PB: predicated region body
PF: predicated region fallthrough
CT: control target
= control target key end

     0   :  { %9 = vsyncpa [#allocation3], 0  ;;  %s2773_s0 = inlined_call_operand.vmem [shape: f32[32,4], index: 0, kind: input, shape index: {}]   ;;  %s2774_s1 = inlined_call_operand.hbm [shape: f32[480,128], index: 1, kind: input, shape index: {}]   ;;  %s2775_s2 = inlined_call_operand.hbm [shape: f32[48,64], index: 2, kind: input, shape index: {}]   ;;  %s2776_s3 = inlined_call_operand.hbm [shape: f32[80,128], index: 3, kind: input, shape index: {}]   ;;  %s2777_s4 = inlined_call_operand.hbm [shape: f32[2,128], index: 4, kind: output, shape index: {}]  }
   0x1   :  { %10 = vsyncpa [#allocation6], 0 }
   0x2   :  { %11 = vsyncpa [#allocation4], 0  ;;  %s2388_s15 = smov [#allocation5]   ;;  %s2389_s17 = smov [#allocation2]  }
   0x3   :  { %s31_s16 = sshll.u32 %s2388_s15, 4  ;;  %s19_s18 = sshll.u32 %s2389_s17, 4  ;;  %s32_s16 = int_to_ptr.vmem [resolvable:$true] %s31_s16  ;;  %s2428_s18 = int_to_ptr.vmem [resolvable:$true] %s19_s18 }
   0x4   :  { %s2294_s21 = scalar_lea.hbm %s2775_s2, 768 }
   0x5   :  { %p2295_p0 = scmp.ne.s32.totalorder %s2775_s2, %s2294_s21  ;;  %p2298_p1 = scmp.lt.u32.totalorder %s2294_s21, %s2775_s2 }
   0x7   :  { %p2300_p2 = pnand %p2298_p1, %p2295_p0 }
   0x9   :  { %2303 = shalt.err (!%p2300_p2)
}
   0xa   :  { %s2304_s26 = scalar_lea.vmem %s32_s16, 768  ;;  %p2309_p4 = scmp.lt.s32.totalorder %s32_s16, %s32_s16 }
   0xb   :  { %p2305_p3 = scmp.ne.s32.totalorder %s32_s16, %s2304_s26  ;;  %p2310_p5 = scmp.lt.s32.totalorder %s2304_s26, %s2304_s26 }
   0xd   :  { %p2311_p6 = por %p2310_p5, %p2309_p4 }
   0xf   :  { %p2312_p7 = pnand %p2311_p6, %p2305_p3 }
  0x11   :  { %2315 = shalt.err (!%p2312_p7)
}
  0x12   :  { %s2390_s27 = smov 128   ;;  %s2391_s28 = smov 8  }
  0x13   :  { %37 = dma.hbm_to_vmem [thread:$0]  %s2775_s2, 768, %s32_s16, [#allocation6], %s2390_s27, %s2390_s27, %s2391_s28  }
  0x14   :  { %s2316_s7 = scalar_lea.hbm %s2774_s1, 7680 }
  0x15   :  { %p2317_p8 = scmp.ne.s32.totalorder %s2774_s1, %s2316_s7  ;;  %p2320_p9 = scmp.lt.u32.totalorder %s2316_s7, %s2774_s1 }
  0x17   :  { %p2322_p10 = pnand %p2320_p9, %p2317_p8 }
  0x19   :  { %2325 = shalt.err (!%p2322_p10)
}
  0x1a   :  { %s2326_s12 = scalar_lea.vmem %s2428_s18, 7680  ;;  %p2331_p12 = scmp.lt.s32.totalorder %s2428_s18, %s2428_s18 }
  0x1b   :  { %p2327_p11 = scmp.ne.s32.totalorder %s2428_s18, %s2326_s12  ;;  %p2332_p13 = scmp.lt.s32.totalorder %s2326_s12, %s2326_s12 }
  0x1d   :  { %p2333_p0 = por %p2332_p13, %p2331_p12 }
  0x1f   :  { %p2334_p1 = pnand %p2333_p0, %p2327_p11 }
  0x21   :  { %2337 = shalt.err (!%p2334_p1)
}
  0x22   :  { %25 = dma.hbm_to_vmem [thread:$0]  %s2774_s1, 7680, %s2428_s18, [#allocation3], %s2390_s27, %s2390_s27, %s2391_s28  }
  0x23   :  { %s2392_s14 = smov [#allocation7]   ;;  %s2338_s19 = scalar_lea.hbm %s2776_s3, 1280 }
  0x24   :  { %s43_s15 = sshll.u32 %s2392_s14, 4  ;;  %p2339_p2 = scmp.ne.s32.totalorder %s2776_s3, %s2338_s19  ;;  %s44_s15 = int_to_ptr.vmem [resolvable:$true] %s43_s15 }
  0x25   :  { %p2342_p3 = scmp.lt.u32.totalorder %s2338_s19, %s2776_s3 }
  0x27   :  { %p2344_p4 = pnand %p2342_p3, %p2339_p2 }
  0x29   :  { %2347 = shalt.err (!%p2344_p4)
}
  0x2a   :  { %s2348_s24 = scalar_lea.vmem %s44_s15, 1280  ;;  %p2353_p6 = scmp.lt.s32.totalorder %s44_s15, %s44_s15 }
  0x2b   :  { %p2349_p5 = scmp.ne.s32.totalorder %s44_s15, %s2348_s24  ;;  %p2354_p7 = scmp.lt.s32.totalorder %s2348_s24, %s2348_s24 }
  0x2d   :  { %p2355_p8 = por %p2354_p7, %p2353_p6 }
  0x2f   :  { %p2356_p9 = pnand %p2355_p8, %p2349_p5 }
  0x31   :  { %2359 = shalt.err (!%p2356_p9)
}
  0x32   :  { %49 = dma.hbm_to_vmem [thread:$0]  %s2776_s3, 1280, %s44_s15, [#allocation6], %s2390_s27, %s2390_s27, %s2391_s28  }
  0x33   :  { %2382 = dma.done.wait [#allocation3], 7680  }
  0x34   :  { %2383 = vsyncadd [#allocation3], 4294959616 }
  0x35   :  { %2384 = dma.done.wait [#allocation6], 2048  }
  0x36   :  { %2385 = vsyncadd [#allocation6], 4294965248  ;;  %v59_v0 = vlaneseq  ;;  %v2393_v1 = vmov 1   ;;  %v69_v3 = vld [vmem:[#allocation7 + $0x30] sm:$0xff]  ;;  %v67_v4 = vld [vmem:[#allocation7 + $0x20] sm:$0xff]  ;;  %v2394_v19 = vmov 0  }
  0x37   :  { %2257 = vset.pattern.permute.xlu1 %v2393_v1  ;;  %2256 = vset.pattern.permute.xlu0 %v2393_v1  ;;  %v70_v5 = vld [vmem:[#allocation7 + $0x38] sm:$0xff]  ;;  %v73_v6 = vld [vmem:[%s2773_s0] sm:$0xff]  ;;  %v68_v8 = vld [vmem:[#allocation7 + $0x28] sm:$0xff]  ;;  %vm203_vm2 = vcmask 1043456   ;;  %vm2396_vm3 = vmmov 1   ;;  %vm176_vm5 = vcmask 31744  }
  0x38   :  { %v2483_v2 = vshrl.u32 %v59_v0, 7  ;;  %133 = vperm.xlu1 %2257, %v69_v3   ;;  %125 = vperm.xlu0 %2256, %v67_v4   ;;  %v74_v7 = vld [vmem:[%s2773_s0 + $0x8] sm:$0xff]  ;;  %v115_v9 = vrot.slane %v73_v6, 1  ;;  %v75_v11 = vld [vmem:[%s2773_s0 + $0x10] sm:$0xff]  ;;  %v76_v12 = vld [vmem:[%s2773_s0 + $0x18] sm:$0xff]  ;;  %v80_v20 = vrot.slane %v73_v6, 7 }
  0x39   :  { %v116_v10 = vrot.slane %v74_v7, 1  ;;  %v117_v13 = vrot.slane %v75_v11, 1  ;;  %v118_v14 = vrot.slane %v76_v12, 1  ;;  %v81_v21 = vrot.slane %v74_v7, 7  ;;  %s2395_s0 = smov 4   ;;  %v77_v28 = vld [vmem:[#allocation5] sm:$0xff]  ;;  %vm2075_vm4 = vmpackc.low %vm203_vm2, %vm2396_vm3 }
  0x3a   :  { %vm119_vm0 = vcmp.lt.s32.totalorder %v2483_v2, 7  ;;  %v82_v22 = vrot.slane %v75_v11, 7  ;;  %v83_v23 = vrot.slane %v76_v12, 7  ;;  %vm86_vm1 = vcmp.lt.s32.totalorder %v2483_v2, 1  ;;  %v78_v29 = vld [vmem:[#allocation5 + $0x8] sm:$0xf] }
  0x3b   :  { %v122_v15 = vsel %vm119_vm0, %v115_v9, %v116_v10  ;;  %v120_v16 = vsel %vm119_vm0, %v117_v13, %v118_v14  ;;  %v123_v17 = vsel %vm119_vm0, %v118_v14, %v115_v9  ;;  %v121_v18 = vsel %vm119_vm0, %v116_v10, %v117_v13  ;;  %v71_v38 = vld [vmem:[#allocation7 + $0x40] sm:$0xff]  ;;  %v72_v40 = vld [vmem:[#allocation7 + $0x48] sm:$0xff]  ;;  %v644_v2 = vld [vmem:[#allocation2 + $0xe0] sm:$0xff]  ;;  %s2401_s7 = smov 32   ;;  %s2402_s8 = smov [#allocation8]  }
  0x3c   :  { %137 = vperm.xlu1 %2257, %v70_v5   ;;  %129 = vperm.xlu0 %2256, %v68_v8   ;;  %v89_v24 = vsel %vm86_vm1, %v80_v20, %v81_v21  ;;  %v90_v25 = vsel %vm86_vm1, %v83_v23, %v80_v20  ;;  %v88_v26 = vsel %vm86_vm1, %v81_v21, %v82_v22  ;;  %vm181_vm6 = vcmask 64512   ;;  %s1724_s9 = sshll.u32 %s2402_s8, 4  ;;  %s1725_s9 = int_to_ptr.vmem [resolvable:$true] %s1724_s9 }
  0x3d   :  { %v87_v27 = vsel %vm86_vm1, %v82_v22, %v83_v23  ;;  %v2074_v30 = vpack.c.bf16 %v78_v29, %v77_v28  ;;  %vm190_vm7 = vcmask 97280   ;;  %vm308_vm8 = vcmask 261120   ;;  %s2360_s10 = scalar_lea.vmem %s1725_s9, 32  ;;  %p2365_p11 = scmp.lt.s32.totalorder %s1725_s9, %s1725_s9 }
  0x3e   :  { %vm453_vm9 = vcmask 523264   ;;  %vm2399_vm10 = vmmov 0   ;;  %vm549_vm11 = vcmask 130048   ;;  %p2361_p10 = scmp.ne.s32.totalorder %s1725_s9, %s2360_s10  ;;  %p2366_p12 = scmp.lt.s32.totalorder %s2360_s10, %s2360_s10 }
  0x3f   :  { %2076 = vmatprep.subr.msk.bf16.mxu0 %vm2075_vm4, %v2074_v30 }
  0x40   :  { %2259 = vset.pattern.permute.xlu1 %v2394_v19  ;;  %2258 = vset.pattern.permute.xlu0 %v2394_v19  ;;  %p2367_p13 = por %p2366_p12, %p2365_p11 }
  0x41   :  { %98 = vperm.xlu1 %2259, %v68_v8   ;;  %93 = vperm.xlu0 %2258, %v67_v4   ;;  %v1734_v4 = vld [vmem:[#allocation7] ss:$0 sm:$0xff] }
  0x42   :  { %2079 = vmatpush3.bf16.msk.msra.mxu0 %vm2075_vm4, %v2074_v30  ;;  %p2368_p0 = pnand %p2367_p13, %p2361_p10 }
  0x45   :  { %103 = vperm.xlu1 %2259, %v69_v3   ;;  %108 = vperm.xlu0 %2258, %v70_v5   ;;  %v64_v3 = vld [vmem:[#allocation7 + $0x8] sm:$0xff] }
  0x46   :  { %1879 = vmatprep.mubr.msk.f32.mxu1 %vm308_vm8, %v64_v3 }
  0x49   :  { %148 = vrot.lane.b32.xlu1 %v73_v6, %s2395_s0  ;;  %150 = vrot.lane.b32.xlu0 %v74_v7, %s2395_s0 }
  0x4a   :  { %2260 = vset.pattern.permute.xlu0 %v2393_v1 }
  0x4d   :  { %152 = vrot.lane.b32.xlu1 %v75_v11, %s2395_s0  ;;  %154 = vrot.lane.b32.xlu0 %v76_v12, %s2395_s0 }
  0xb7   :  { %v134_v31 = vpop.permute.xlu1 %133  ;;  %v126_v32 = vpop.permute.xlu0 %125 }
  0xb8   :  { %v140_v33 = vmul.f32 %v126_v32, %v122_v15  ;;  %v142_v34 = vmul.f32 %v134_v31, %v120_v16  ;;  %v65_v31 = vld [vmem:[#allocation7 + $0x10] sm:$0xff] }
  0xb9   :  { %v390_v32 = vld [vmem:[#allocation2] sm:$0xff] }
  0xba   :  { %164 = vrot.lane.b32.xlu1 %v140_v33, %s2391_s28  ;;  %v391_v33 = vld [vmem:[#allocation2 + $0x8] sm:$0xff] }
  0xbb   :  { %v130_v35 = vpop.permute.xlu0 %129  ;;  %v138_v37 = vpop.permute.xlu1 %137 }
  0xbc   :  { %v141_v36 = vmul.f32 %v130_v35, %v121_v18  ;;  %v143_v39 = vmul.f32 %v138_v37, %v123_v17  ;;  %v2397_v35 = vmov 0.0|0.0   ;;  %v393_v37 = vld [vmem:[#allocation2 + $0x18] sm:$0xff] }
  0xbd   :  { %2088 = vmatprep.subr.bf16.mxu0 %v2397_v35 }
  0xbe   :  { %168 = vrot.lane.b32.xlu1 %v142_v34, %s2391_s28  ;;  %166 = vrot.lane.b32.xlu0 %v141_v36, %s2391_s28  ;;  %v392_v34 = vld [vmem:[#allocation2 + $0x10] sm:$0xff]  ;;  %v2089_v36 = vpack.c.bf16 %v391_v33, %v390_v32 }
  0xc0   :  { %v99_v41 = vpop.permute.xlu1 %98  ;;  %v94_v42 = vpop.permute.xlu0 %93 }
  0xc1   :  { %v111_v47 = vmul.f32 %v94_v42, %v90_v25  ;;  %v112_v49 = vmul.f32 %v99_v41, %v89_v24  ;;  %v396_v42 = vld [vmem:[#allocation2 + $0x30] sm:$0xff] }
  0xc2   :  { %421 = vperm.xlu1 %2259, %v71_v38   ;;  %170 = vrot.lane.b32.xlu0 %v143_v39, %s2391_s28  ;;  %v394_v39 = vld [vmem:[#allocation2 + $0x20] sm:$0xff]  ;;  %s2398_s28 = smov 64  }
  0xc4   :  { %v104_v43 = vpop.permute.xlu1 %103  ;;  %v109_v44 = vpop.permute.xlu0 %108 }
  0xc5   :  { %v113_v50 = vmul.f32 %v104_v43, %v88_v26  ;;  %v114_v55 = vmul.f32 %v109_v44, %v87_v27  ;;  %v397_v43 = vld [vmem:[#allocation2 + $0x38] sm:$0xff] }
  0xc6   :  { %426 = vperm.xlu1 %2259, %v72_v40   ;;  %436 = vperm.xlu0 %2260, %v71_v38   ;;  %v2092_v38 = vpack.c.bf16 %v393_v37, %v392_v34  ;;  %v2098_v44 = vpack.c.bf16 %v397_v43, %v396_v42 }
  0xc8   :  { %v149_v45 = vpop.permute.xlu1 %148  ;;  %v151_v46 = vpop.permute.xlu0 %150 }
  0xc9   :  { %v177_v51 = vsel %vm176_vm5, %v111_v47, %v149_v45  ;;  %v178_v56 = vsel %vm176_vm5, %v112_v49, %v151_v46  ;;  %v398_v45 = vld [vmem:[#allocation2 + $0x40] sm:$0xff]  ;;  %v399_v46 = vld [vmem:[#allocation2 + $0x48] sm:$0xff]  ;;  %v401_v49 = vld [vmem:[#allocation2 + $0x58] sm:$0xff] }
  0xca   :  { %2261 = vset.pattern.permute.xlu1 %v2393_v1  ;;  %v2101_v47 = vpack.c.bf16 %v399_v46, %v398_v45  ;;  %v640_v46 = vld [vmem:[#allocation2 + $0xc0] sm:$0xff] }
  0xcb   :  { %440 = vperm.xlu1 %2261, %v72_v40   ;;  %v395_v40 = vld [vmem:[#allocation2 + $0x28] sm:$0xff] }
  0xcc   :  { %v153_v48 = vpop.permute.xlu1 %152  ;;  %v155_v52 = vpop.permute.xlu0 %154  ;;  %v2095_v41 = vpack.c.bf16 %v395_v40, %v394_v39 }
  0xcd   :  { %v179_v57 = vsel %vm176_vm5, %v113_v50, %v153_v48  ;;  %v180_v62 = vsel %vm176_vm5, %v114_v55, %v155_v52  ;;  %v400_v48 = vld [vmem:[#allocation2 + $0x50] sm:$0xff]  ;;  %v403_v52 = vld [vmem:[#allocation2 + $0x68] sm:$0xff]  ;;  %v405_v55 = vld [vmem:[#allocation2 + $0x78] sm:$0xff] }
  0xce   :  { %v2104_v50 = vpack.c.bf16 %v401_v49, %v400_v48  ;;  %v66_v49 = vld [vmem:[#allocation7 + $0x18] sm:$0xff] }
 0x12c   :  { %v165_v53 = vpop.permute.xlu1 %164 }
 0x12d   :  { %v182_v54 = vsel %vm181_vm6, %v177_v51, %v165_v53  ;;  %v402_v51 = vld [vmem:[#allocation2 + $0x60] sm:$0xff] }
 0x12e   :  { %1865 = vmatprep.mubr.msk.f32.mxu0 %vm190_vm7, %v182_v54  ;;  %v2107_v53 = vpack.c.bf16 %v403_v52, %v402_v51  ;;  %v404_v54 = vld [vmem:[#allocation2 + $0x70] sm:$0xff]  ;;  %v643_v52 = vld [vmem:[#allocation2 + $0xd8] sm:$0xff] }
 0x12f   :  { %v642_v51 = vld [vmem:[#allocation2 + $0xd0] sm:$0xff] }
 0x130   :  { %v169_v58 = vpop.permute.xlu1 %168  ;;  %v167_v59 = vpop.permute.xlu0 %166 }
 0x131   :  { %v184_v60 = vsel %vm181_vm6, %v179_v57, %v169_v58  ;;  %v183_v61 = vsel %vm181_vm6, %v178_v56, %v167_v59  ;;  %v2110_v56 = vpack.c.bf16 %v405_v55, %v404_v54  ;;  %v406_v57 = vld [vmem:[#allocation2 + $0x80] sm:$0xff]  ;;  %v407_v58 = vld [vmem:[#allocation2 + $0x88] sm:$0xff] }
 0x132   :  { %1866 = vmatmul.mubr.msk.f32.vlgmr.msra.gmra.mrb[0].mxu0 %vm190_vm7, %v183_v61  ;;  %v2113_v59 = vpack.c.bf16 %v407_v58, %v406_v57  ;;  %v409_v61 = vld [vmem:[#allocation2 + $0x98] sm:$0xff]  ;;  %v645_v54 = vld [vmem:[#allocation2 + $0xe8] sm:$0xff] }
 0x133   :  { %1868 = vmatprep.mubr.msk.f32.mxu0 %vm190_vm7, %v184_v60  ;;  %2090 = vmatpush1.bf16.msra.mxu0 %v2089_v36  ;;  %v408_v60 = vld [vmem:[#allocation2 + $0x90] sm:$0xff]  ;;  %v2134_v55 = vpack.c.bf16 %v645_v54, %v644_v2  ;;  %v647_v57 = vld [vmem:[#allocation2 + $0xf8] sm:$0xff] }
 0x134   :  { %v171_v63 = vpop.permute.xlu0 %170  ;;  %2091 = vmatprep.subr.bf16.mxu0 %v2397_v35 }
 0x135   :  { %v185_v1 = vsel %vm181_vm6, %v180_v62, %v171_v63  ;;  %v2116_v62 = vpack.c.bf16 %v409_v61, %v408_v60  ;;  %v410_v63 = vld [vmem:[#allocation2 + $0xa0] sm:$0xff]  ;;  %v649_v60 = vld [vmem:[#allocation2 + $0x108] sm:$0xff] }
 0x136   :  { %1869 = vmatmul.mubr.msk.f32.gmra.mrb[2].mxu0 %vm190_vm7, %v185_v1  ;;  %v411_v1 = vld [vmem:[#allocation2 + $0xa8] sm:$0xff] }
 0x137   :  { %2093 = vmatpush1.bf16.msra.mxu0 %v2092_v38  ;;  %v2119_v3 = vpack.c.bf16 %v411_v1, %v410_v63  ;;  %v651_v63 = vld [vmem:[#allocation2 + $0x118] sm:$0xff] }
 0x138   :  { %2094 = vmatprep.subr.bf16.mxu0 %v2397_v35 }
 0x13b   :  { %2096 = vmatpush1.bf16.msra.mxu0 %v2095_v41 }
 0x13c   :  { %2097 = vmatprep.subr.bf16.mxu0 %v2397_v35 }
 0x13f   :  { %2099 = vmatpush1.bf16.msra.mxu0 %v2098_v44 }
 0x140   :  { %2100 = vmatprep.subr.bf16.mxu0 %v2397_v35 }
 0x143   :  { %2102 = vmatpush1.bf16.msra.mxu0 %v2101_v47  ;;  %v641_v47 = vld [vmem:[#allocation2 + $0xc8] sm:$0xff] }
 0x144   :  { %2103 = vmatprep.subr.bf16.mxu0 %v2397_v35 }
 0x147   :  { %2105 = vmatpush1.bf16.msra.mxu0 %v2104_v50  ;;  %v2128_v50 = vpack.c.bf16 %v641_v47, %v640_v46  ;;  %v634_v46 = vld [vmem:[#allocation2 + $0x198] sm:$0xff] }
 0x148   :  { %2106 = vmatprep.subr.bf16.mxu0 %v2397_v35 }
 0x14b   :  { %2108 = vmatpush1.bf16.msra.mxu0 %v2107_v53  ;;  %v2131_v53 = vpack.c.bf16 %v643_v52, %v642_v51 }
 0x14c   :  { %2109 = vmatprep.subr.bf16.mxu0 %v2397_v35 }
 0x14f   :  { %2111 = vmatpush1.bf16.msra.mxu0 %v2110_v56  ;;  %v646_v56 = vld [vmem:[#allocation2 + $0xf0] sm:$0xff] }
 0x150   :  { %2112 = vmatprep.subr.bf16.mxu0 %v2397_v35  ;;  %v2137_v58 = vpack.c.bf16 %v647_v57, %v646_v56 }
 0x153   :  { %2114 = vmatpush1.bf16.msra.mxu0 %v2113_v59  ;;  %v648_v59 = vld [vmem:[#allocation2 + $0x100] sm:$0xff] }
 0x154   :  { %2115 = vmatprep.subr.bf16.mxu0 %v2397_v35  ;;  %v2140_v61 = vpack.c.bf16 %v649_v60, %v648_v59 }
 0x157   :  { %2117 = vmatpush1.bf16.msra.mxu0 %v2116_v62  ;;  %v650_v62 = vld [vmem:[#allocation2 + $0x110] sm:$0xff] }
 0x158   :  { %2118 = vmatprep.subr.bf16.mxu0 %v2397_v35  ;;  %v2143_v1 = vpack.c.bf16 %v651_v63, %v650_v62 }
 0x15b   :  { %2120 = vmatpush1.bf16.msra.mxu0 %v2119_v3  ;;  %v652_v3 = vld [vmem:[#allocation2 + $0x120] sm:$0xff] }
 0x15c   :  { %2121 = vmatprep.subr.bf16.mxu0 %v2397_v35 }
 0x205   :  { %v1867_v5 = vpop.f32.mrb[0].mxu0 }
 0x206   :  { %v279_v6 = vadd.f32 %v1867_v5, %v1734_v4  ;;  %v273_v7 = vpop.f32.mrb[1].mxu0  ;;  %v413_v5 = vld [vmem:[#allocation2 + $0xb8] sm:$0xff] }
 0x207   :  { %v274_v8 = vadd.f32 %v1734_v4, %v273_v7 }
 0x208   :  { %v293_v9 = vmax.f32 %v279_v6, 0.0 }
 0x209   :  { %v292_v10 = vmax.f32 %v274_v8, 0.0  ;;  %v1870_v11 = vpop.f32.mrb[2].mxu0 }
 0x20a   :  { %v297_v12 = vrot.slane %v293_v9, 1  ;;  %v289_v13 = vadd.f32 %v1870_v11, %v1734_v4  ;;  %v283_v14 = vpop.f32.mrb[3].mxu0 }
 0x20b   :  { %v296_v15 = vrot.slane %v292_v10, 1  ;;  %v284_v16 = vadd.f32 %v1734_v4, %v283_v14  ;;  %v412_v4 = vld [vmem:[#allocation2 + $0xb0] sm:$0xff] }
 0x20c   :  { %v295_v17 = vmax.f32 %v289_v13, 0.0  ;;  %v2122_v6 = vpack.c.bf16 %v413_v5, %v412_v4  ;;  %v437_v13 = vpop.permute.xlu0 %436  ;;  %v653_v4 = vld [vmem:[#allocation2 + $0x128] sm:$0xff] }
 0x20d   :  { %v302_v18 = vsel %vm119_vm0, %v296_v15, %v297_v12  ;;  %v294_v19 = vmax.f32 %v284_v16, 0.0  ;;  %v2146_v5 = vpack.c.bf16 %v653_v4, %v652_v3 }
 0x20e   :  { %v304_v20 = vmax.f32 %v292_v10, %v302_v18  ;;  %v299_v21 = vrot.slane %v295_v17, 1  ;;  %2123 = vmatpush1.bf16.msra.mxu0 %v2122_v6  ;;  %v654_v6 = vld [vmem:[#allocation2 + $0x130] sm:$0xff] }
 0x20f   :  { %v298_v22 = vrot.slane %v294_v19, 1  ;;  %2157 = vmatprep.subr.bf16.mxu0 %v2397_v35 }
 0x210   :  { %v303_v23 = vsel %vm119_vm0, %v299_v21, %v296_v15 }
 0x211   :  { %v307_v24 = vmax.f32 %v295_v17, %v303_v23  ;;  %v300_v25 = vsel %vm119_vm0, %v298_v22, %v299_v21  ;;  %v301_v26 = vsel %vm119_vm0, %v297_v12, %v298_v22 }
 0x212   :  { %v306_v27 = vmax.f32 %v294_v19, %v300_v25  ;;  %v305_v28 = vmax.f32 %v293_v9, %v301_v26  ;;  %v422_v19 = vpop.permute.xlu1 %421 }
 0x214   :  { %v2080_v29 = vpack.c.bf16 %v305_v28, %v304_v20  ;;  %v2084_v30 = vpack.c.bf16 %v307_v24, %v306_v27 }
 0x216   :  { %2081 = vmatprep.subr.bf16.mxu1 %v2080_v29  ;;  %v427_v20 = vpop.permute.xlu1 %426 }
 0x217   :  { %2083 = vmatpush3.bf16.msra.mxu1 %v2080_v29  ;;  %v2400_v29 = vmov 0.0  }
 0x218   :  { %2085 = vmatprep.subr.bf16.mxu1 %v2084_v30 }
 0x21a   :  { %v441_v21 = vpop.permute.xlu1 %440 }
 0x21b   :  { %2087 = vmatpush3.bf16.msra.mxu1 %v2084_v30  ;;  %v1742_v30 = vld [vmem:[#allocation7 + $0x1] ss:$0 sm:$0xff] }
 0x21c   :  { %2124 = vmatprep.subr.bf16.mxu1 %v2397_v35 }
 0x21e   :  { %1880 = vmatmul.mubr.msk.f32.vlgmr.msra.gmra.mrb[0].mxu1 %vm308_vm8, %v65_v31 }
 0x21f   :  { %1886 = vmatprep.mubr.msk.f32.mxu1 %vm2399_vm10, %v2400_v29 }
 0x2f1   :  { %v1881_v7 = vpop.f32.mrb[0].mxu1 }
 0x2f2   :  { %v416_v8 = vrot.slane %v1881_v7, 7  ;;  %v432_v9 = vrot.slane %v1881_v7, 1  ;;  %449 = vrot.lane.b32.xlu1 %v1881_v7, %s2398_s28  ;;  %v381_v10 = vpop.f32.mrb[1].mxu1  ;;  %v655_v7 = vld [vmem:[#allocation2 + $0x138] sm:$0xff] }
 0x2f3   :  { %v415_v11 = vrot.slane %v381_v10, 7  ;;  %v431_v12 = vrot.slane %v381_v10, 1  ;;  %447 = vrot.lane.b32.xlu0 %v381_v10, %s2398_s28  ;;  %v624_v10 = vld [vmem:[#allocation2 + $0x148] sm:$0xff] }
 0x2f5   :  { %v434_v14 = vsel %vm119_vm0, %v432_v9, %v431_v12  ;;  %v433_v15 = vsel %vm119_vm0, %v431_v12, %v432_v9  ;;  %v418_v16 = vsel %vm86_vm1, %v416_v8, %v415_v11  ;;  %v417_v17 = vsel %vm86_vm1, %v415_v11, %v416_v8  ;;  %v623_v9 = vld [vmem:[#allocation2 + $0x140] sm:$0xff]  ;;  %v625_v12 = vld [vmem:[#allocation2 + $0x150] sm:$0xff] }
 0x2f6   :  { %v443_v18 = vmul.f32 %v437_v13, %v433_v15  ;;  %v429_v22 = vmul.f32 %v422_v19, %v418_v16  ;;  %v444_v24 = vmul.f32 %v441_v21, %v434_v14  ;;  %v430_v27 = vmul.f32 %v427_v20, %v417_v17  ;;  %v626_v13 = vld [vmem:[#allocation2 + $0x158] sm:$0xff]  ;;  %v1747_v19 = vld [vmem:[#allocation7 + $0x2] ss:$0 sm:$0xff] }
 0x2f7   :  { %v2149_v8 = vpack.c.bf16 %v655_v7, %v654_v6  ;;  %v2590_v11 = vpack.c.bf16 %v624_v10, %v623_v9  ;;  %v2593_v16 = vpack.c.bf16 %v626_v13, %v625_v12 }
 0x2f8   :  { %1743 = vmatprep.mubr.msk.f32.mxu0 %vm453_vm9, %v443_v18 }
 0x364   :  { %v450_v26 = vpop.permute.xlu1 %449 }
 0x365   :  { %v448_v23 = vpop.permute.xlu0 %447  ;;  %v455_v28 = vsel %vm453_vm9, %v430_v27, %v450_v26 }
 0x366   :  { %v454_v25 = vsel %vm453_vm9, %v429_v22, %v448_v23 }
 0x367   :  { %531 = vmatmul.mubr.f32.vlgmr.msra.gmra.mrb[4].mxu0 %v454_v25 }
 0x368   :  { %1744 = vmatprep.mubr.msk.f32.mxu0 %vm453_vm9, %v444_v24  ;;  %v60_v24 = vand.u32 127, %v59_v0 }
 0x36a   :  { %vm61_vm12 = vcmp.ge.s32.totalorder %v60_v24, 64  ;;  %vm62_vm13 = vcmp.lt.s32.totalorder %v60_v24, 96 }
 0x36b   :  { %536 = vmatmul.mubr.f32.gmra.mrb[6].mxu0 %v455_v28  ;;  %vm2611_vm14 = vmand %vm61_vm12, %vm62_vm13 }
 0x36c   :  { %1951 = vmatprep.mubr.msk.f32.mxu0 %vm2399_vm10, %v2400_v29 }
 0x43a   :  { %v532_v31 = vpop.f32.mrb[4].mxu0 }
 0x43b   :  { %v533_v32 = vadd.f32 %v1742_v30, %v532_v31  ;;  %v534_v33 = vpop.f32.mrb[5].mxu0 }
 0x43d   :  { %v541_v36 = vmax.f32 %v533_v32, 0.0 }
 0x43e   :  { %v537_v34 = vpop.f32.mrb[6].mxu0 }
 0x43f   :  { %v538_v37 = vadd.f32 %v1742_v30, %v537_v34  ;;  %v539_v38 = vpop.f32.mrb[7].mxu0  ;;  %v543_v40 = vrot.slane %v541_v36, 1 }
 0x440   :  { %v629_v38 = vld [vmem:[#allocation2 + $0x170] sm:$0xff] }
 0x441   :  { %v542_v39 = vmax.f32 %v538_v37, 0.0  ;;  %v628_v37 = vld [vmem:[#allocation2 + $0x168] sm:$0xff] }
 0x443   :  { %v544_v41 = vrot.slane %v542_v39, 1 }
 0x445   :  { %v545_v42 = vsel %vm119_vm0, %v543_v40, %v544_v41  ;;  %v546_v43 = vsel %vm119_vm0, %v544_v41, %v543_v40  ;;  %v630_v40 = vld [vmem:[#allocation2 + $0x178] sm:$0xff] }
 0x446   :  { %v547_v44 = vmax.f32 %v541_v36, %v545_v42  ;;  %v548_v45 = vmax.f32 %v542_v39, %v546_v43  ;;  %v627_v36 = vld [vmem:[#allocation2 + $0x160] sm:$0xff]  ;;  %v2625_v41 = vpack.c.bf16 %v630_v40, %v629_v38  ;;  %v632_v43 = vld [vmem:[#allocation2 + $0x188] sm:$0xff] }
 0x447   :  { %v2622_v39 = vpack.c.bf16 %v628_v37, %v627_v36  ;;  %v631_v42 = vld [vmem:[#allocation2 + $0x180] sm:$0xff] }
 0x448   :  { %v2125_v48 = vpack.c.bf16 %v548_v45, %v547_v44  ;;  %v2629_v44 = vpack.c.bf16 %v632_v43, %v631_v42  ;;  %v633_v45 = vld [vmem:[#allocation2 + $0x190] sm:$0xff] }
 0x449   :  { %2159 = vmatpush3.bf16.msra.mxu0 %v2622_v39 }
 0x44a   :  { %2126 = vmatpush3.bf16.msra.mxu1 %v2125_v48  ;;  %2160 = vmatprep.subr.bf16.mxu0 %v2397_v35  ;;  %v2634_v48 = vpack.c.bf16 %v634_v46, %v633_v45 }
 0x44b   :  { %2127 = vmatprep.subr.bf16.mxu1 %v2397_v35 }
 0x44d   :  { %1887 = vmatmul.mubr.msk.f32.vlgmr.msra.gmra.mrb[2].mxu1 %vm549_vm11, %v66_v49  ;;  %2162 = vmatpush3.bf16.msra.mxu0 %v2625_v41 }
 0x44e   :  { %2129 = vmatpush3.bf16.msra.mxu1 %v2128_v50  ;;  %1921 = vmatprep.mubr.msk.f32.mxu1 %vm2399_vm10, %v2400_v29 }
 0x44f   :  { %2130 = vmatprep.subr.bf16.mxu1 %v2397_v35  ;;  %2163 = vmatprep.subr.bf16.mxu0 %v2397_v35 }
 0x451   :  { %2165 = vmatpush3.bf16.msra.mxu0 %v2629_v44 }
 0x452   :  { %2132 = vmatpush3.bf16.msra.mxu1 %v2131_v53  ;;  %2166 = vmatprep.subr.bf16.mxu0 %v2397_v35  ;;  %v2663_v53 = vld [vmem:[#allocation7 + $0x3] ss:$0 sm:$0xff] }
 0x453   :  { %2133 = vmatprep.subr.bf16.mxu1 %v2397_v35 }
 0x455   :  { %2168 = vmatpush3.bf16.msra.mxu0 %v2634_v48 }
 0x456   :  { %2135 = vmatpush3.bf16.msra.mxu1 %v2134_v55  ;;  %2193 = vmatprep.subr.bf16.mxu0 %v2397_v35 }
 0x457   :  { %2136 = vmatprep.subr.bf16.mxu1 %v2397_v35 }
 0x45a   :  { %2138 = vmatpush3.bf16.msra.mxu1 %v2137_v58 }
 0x45b   :  { %2139 = vmatprep.subr.bf16.mxu1 %v2397_v35 }
 0x45e   :  { %2141 = vmatpush3.bf16.msra.mxu1 %v2140_v61 }
 0x45f   :  { %2142 = vmatprep.subr.bf16.mxu1 %v2397_v35 }
 0x462   :  { %2144 = vmatpush3.bf16.msra.mxu1 %v2143_v1 }
 0x463   :  { %2145 = vmatprep.subr.bf16.mxu1 %v2397_v35 }
 0x466   :  { %2147 = vmatpush3.bf16.msra.mxu1 %v2146_v5 }
 0x467   :  { %2148 = vmatprep.subr.bf16.mxu1 %v2397_v35 }
 0x46a   :  { %2150 = vmatpush3.bf16.msra.mxu1 %v2149_v8 }
 0x46b   :  { %2151 = vmatprep.subr.bf16.mxu1 %v2397_v35 }
 0x520   :  { %v619_v14 = vpop.f32.mrb[2].mxu1 }
 0x521   :  { %v1888_v15 = vpop.f32.mrb[3].mxu1  ;;  %1922 = vmatmul.mubr.f32.vlgmr.msra.gmra.mrb[4].mxu1 %v619_v14 }
 0x522   :  { %2153 = vmatpush3.bf16.msra.mxu1 %v2590_v11  ;;  %1932 = vmatprep.mubr.msk.f32.mxu1 %vm2399_vm10, %v2400_v29 }
 0x523   :  { %2154 = vmatprep.subr.bf16.mxu1 %v2397_v35 }
 0x526   :  { %2156 = vmatpush3.bf16.msra.mxu1 %v2593_v16 }
 0x527   :  { %2169 = vmatprep.subr.bf16.mxu1 %v2397_v35 }
 0x529   :  { %1933 = vmatmul.mubr.f32.vlgmr.msra.gmra.mrb[6].mxu1 %v2400_v29 }
 0x52a   :  { %2171 = vmatpush3.bf16.msra.mxu1 %v2590_v11  ;;  %1962 = vmatprep.mubr.msk.f32.mxu1 %vm2399_vm10, %v2400_v29 }
 0x52b   :  { %2172 = vmatprep.subr.bf16.mxu1 %v2397_v35 }
 0x52e   :  { %2174 = vmatpush3.bf16.msra.mxu1 %v2593_v16 }
 0x52f   :  { %2175 = vmatprep.subr.bf16.mxu1 %v2397_v35 }
 0x5f4   :  { %v727_v17 = vpop.f32.mrb[4].mxu1 }
 0x5f5   :  { %v1923_v18 = vpop.f32.mrb[5].mxu1  ;;  %v2607_v20 = vadd.f32 %v1747_v19, %v727_v17 }
 0x5fc   :  { %v800_v21 = vpop.f32.mrb[6].mxu1 }
 0x5fd   :  { %v804_v22 = vadd.f32 %v800_v21, %v2607_v20  ;;  %v1934_v23 = vpop.f32.mrb[7].mxu1 }
 0x5ff   :  { %2262 = vtanh.f32 %v804_v22 }
 0x609   :  { %v2263_v25 = vpop.eup %2262 }
 0x60a   :  { %v806_v26 = vadd.f32 1.0, %v2263_v25 }
 0x60c   :  { %v807_v28 = vmul.f32 0.5, %v806_v26 }
 0x60e   :  { %v808_v30 = vsel %vm2611_vm14, %v2263_v25, %v807_v28 }
 0x60f   :  { %811 = vrot.lane.b32.xlu0 %v808_v30, %s2398_s28  ;;  %v809_v0 = vmul.f32 0.0, %v808_v30 }
 0x681   :  { %v812_v31 = vpop.permute.xlu0 %811 }
 0x682   :  { %v814_v32 = vmul.f32 %v812_v31, %v808_v30 }
 0x684   :  { %816 = vrot.lane.b32.xlu1 %v814_v32, %s2401_s7 }
 0x6f6   :  { %v817_v33 = vpop.permute.xlu1 %816 }
 0x6f7   :  { %v2619_v34 = vadd.f32 %v817_v33, %v809_v0 }
 0x6f9   :  { %2264 = vtanh.f32 %v2619_v34  ;;  %v1006_v10 = vrot.slane %v2619_v34, 6 }
 0x703   :  { %v2265_v47 = vpop.eup %2264 }
 0x704   :  { %822 = vrot.lane.b32.xlu0 %v2265_v47, %s2398_s28 }
 0x776   :  { %v823_v49 = vpop.permute.xlu0 %822 }
 0x777   :  { %v825_v50 = vmul.f32 %v823_v49, %v808_v30 }
 0x779   :  { %827 = vrot.lane.b32.xlu1 %v825_v50, %s2401_s7 }
 0x7eb   :  { %v828_v51 = vpop.permute.xlu1 %827 }
 0x7ec   :  { %v830_v52 = vsel %vm308_vm8, %v828_v51, 0.0  ;;  %1963 = vmatmul.mubr.msk.f32.vlgmr.msra.gmra.mrb[8].mxu1 %vm308_vm8, %v828_v51 }
 0x7ed   :  { %1952 = vmatmul.mubr.msk.f32.vlgmr.msra.gmra.mrb[8].mxu0 %vm453_vm9, %v830_v52  ;;  %2177 = vmatpush3.bf16.msra.mxu1 %v2622_v39 }
 0x7ee   :  { %2178 = vmatprep.subr.bf16.mxu1 %v2397_v35  ;;  %1981 = vmatprep.mubr.msk.f32.mxu1 %vm2399_vm10, %v2400_v29 }
 0x7ef   :  { %2195 = vmatpush3.bf16.msra.mxu0 %v2622_v39  ;;  %2011 = vmatprep.mubr.msk.f32.mxu0 %vm2399_vm10, %v2400_v29 }
 0x7f0   :  { %2196 = vmatprep.subr.bf16.mxu0 %v2397_v35 }
 0x7f1   :  { %2180 = vmatpush3.bf16.msra.mxu1 %v2625_v41 }
 0x7f2   :  { %2181 = vmatprep.subr.bf16.mxu1 %v2397_v35 }
 0x7f3   :  { %2198 = vmatpush3.bf16.msra.mxu0 %v2625_v41 }
 0x7f4   :  { %2199 = vmatprep.subr.bf16.mxu0 %v2397_v35 }
 0x7f5   :  { %2183 = vmatpush3.bf16.msra.mxu1 %v2629_v44 }
 0x7f6   :  { %2184 = vmatprep.subr.bf16.mxu1 %v2397_v35 }
 0x7f7   :  { %2201 = vmatpush3.bf16.msra.mxu0 %v2629_v44 }
 0x7f8   :  { %2202 = vmatprep.subr.bf16.mxu0 %v2397_v35 }
 0x7f9   :  { %2186 = vmatpush3.bf16.msra.mxu1 %v2634_v48 }
 0x7fa   :  { %2187 = vmatprep.subr.bf16.mxu1 %v2397_v35 }
 0x7fb   :  { %2204 = vmatpush3.bf16.msra.mxu0 %v2634_v48 }
 0x7fc   :  { %2223 = vmatprep.subr.bf16.mxu0 %v2397_v35 }
 0x8bf   :  { %v993_v2 = vpop.f32.mrb[8].mxu1 }
 0x8c0   :  { %v998_v54 = vrot.slane %v993_v2, 6  ;;  %v900_v55 = vpop.f32.mrb[8].mxu0  ;;  %v1964_v56 = vpop.f32.mrb[9].mxu1 }
 0x8c1   :  { %v901_v57 = vadd.f32 %v2663_v53, %v900_v55  ;;  %v1953_v58 = vpop.f32.mrb[9].mxu0 }
 0x8c2   :  { %v1000_v59 = vadd.f32 %v998_v54, %v2607_v20 }
 0x8c3   :  { %2266 = vtanh.f32 %v901_v57 }
 0x8c4   :  { %2268 = vtanh.f32 %v1000_v59 }
 0x8cd   :  { %v2267_v60 = vpop.eup %2266 }
 0x8ce   :  { %v2269_v61 = vpop.eup %2268  ;;  %v905_v62 = vadd.f32 1.0, %v2267_v60 }
 0x8cf   :  { %v1002_v63 = vadd.f32 1.0, %v2269_v61 }
 0x8d0   :  { %v906_v1 = vmul.f32 0.5, %v905_v62 }
 0x8d1   :  { %v1003_v3 = vmul.f32 0.5, %v1002_v63 }
 0x8d2   :  { %v907_v4 = vsel %vm2611_vm14, %v2267_v60, %v906_v1 }
 0x8d3   :  { %910 = vrot.lane.b32.xlu0 %v907_v4, %s2398_s28  ;;  %v1004_v5 = vsel %vm2611_vm14, %v2269_v61, %v1003_v3  ;;  %v908_v12 = vmul.f32 0.0, %v907_v4 }
 0x8d4   :  { %1010 = vrot.lane.b32.xlu1 %v1004_v5, %s2398_s28  ;;  %v1008_v14 = vmul.f32 %v1006_v10, %v1004_v5 }
 0x945   :  { %v911_v6 = vpop.permute.xlu0 %910 }
 0x946   :  { %v913_v7 = vmul.f32 %v911_v6, %v907_v4  ;;  %v1011_v8 = vpop.permute.xlu1 %1010 }
 0x947   :  { %v1013_v9 = vmul.f32 %v1011_v8, %v1004_v5 }
 0x948   :  { %915 = vrot.lane.b32.xlu0 %v913_v7, %s2401_s7 }
 0x949   :  { %1015 = vrot.lane.b32.xlu1 %v1013_v9, %s2401_s7 }
 0x9ba   :  { %v916_v13 = vpop.permute.xlu0 %915 }
 0x9bb   :  { %v918_v15 = vadd.f32 %v916_v13, %v908_v12  ;;  %v1016_v17 = vpop.permute.xlu1 %1015 }
 0x9bc   :  { %v2676_v18 = vadd.f32 %v1016_v17, %v1008_v14 }
 0x9bd   :  { %2270 = vtanh.f32 %v918_v15 }
 0x9be   :  { %2272 = vtanh.f32 %v2676_v18  ;;  %v1214_v59 = vrot.slane %v2676_v18, 6 }
 0x9c7   :  { %v2271_v19 = vpop.eup %2270 }
 0x9c8   :  { %v2273_v21 = vpop.eup %2272  ;;  %921 = vrot.lane.b32.xlu0 %v2271_v19, %s2398_s28 }
 0x9c9   :  { %1021 = vrot.lane.b32.xlu1 %v2273_v21, %s2398_s28 }
 0xa3a   :  { %v922_v22 = vpop.permute.xlu0 %921 }
 0xa3b   :  { %v924_v23 = vmul.f32 %v922_v22, %v907_v4  ;;  %v1022_v24 = vpop.permute.xlu1 %1021 }
 0xa3c   :  { %v1024_v25 = vmul.f32 %v1022_v24, %v1004_v5 }
 0xa3d   :  { %v1030_v26 = vrot.slane %v924_v23, 6 }
 0xa3e   :  { %1026 = vrot.lane.b32.xlu0 %v1024_v25, %s2401_s7  ;;  %v1130_v28 = vrot.slane %v1024_v25, 2 }
 0xa3f   :  { %1031 = vrot.lane.b32.xlu1 %v1030_v26, %s2398_s28 }
 0xa42   :  { %1131 = vrot.lane.b32.xlu0 %v1130_v28, %s2401_s7 }
 0xab0   :  { %v1027_v30 = vpop.permute.xlu0 %1026 }
 0xab1   :  { %v1032_v31 = vpop.permute.xlu1 %1031 }
 0xab2   :  { %v1034_v32 = vsel %vm308_vm8, %v1027_v30, %v1032_v31 }
 0xab3   :  { %v1036_v0 = vrot.slane %v1034_v32, 2 }
 0xab4   :  { %v1132_v33 = vpop.permute.xlu0 %1131 }
 0xab5   :  { %1982 = vmatmul.mubr.msk.f32.vlgmr.msra.gmra.mrb[10].mxu1 %vm453_vm9, %v1036_v0 }
 0xab6   :  { %2189 = vmatpush3.bf16.msra.mxu1 %v2590_v11  ;;  %1992 = vmatprep.mubr.msk.f32.mxu1 %vm2399_vm10, %v2400_v29 }
 0xab7   :  { %2190 = vmatprep.subr.bf16.mxu1 %v2397_v35 }
 0xaba   :  { %2192 = vmatpush3.bf16.msra.mxu1 %v2593_v16 }
 0xabb   :  { %2205 = vmatprep.subr.bf16.mxu1 %v2397_v35 }
 0xabd   :  { %1993 = vmatmul.mubr.msk.f32.vlgmr.msra.gmra.mrb[12].mxu1 %vm308_vm8, %v1132_v33 }
 0xabe   :  { %2207 = vmatpush3.bf16.msra.mxu1 %v2590_v11  ;;  %2022 = vmatprep.mubr.msk.f32.mxu1 %vm2399_vm10, %v2400_v29 }
 0xabf   :  { %2208 = vmatprep.subr.bf16.mxu1 %v2397_v35 }
 0xac2   :  { %2210 = vmatpush3.bf16.msra.mxu1 %v2593_v16 }
 0xac3   :  { %2211 = vmatprep.subr.bf16.mxu1 %v2397_v35 }
 0xb88   :  { %v1105_v34 = vpop.f32.mrb[10].mxu1 }
 0xb89   :  { %v1106_v36 = vadd.f32 %v2663_v53, %v1105_v34  ;;  %v1983_v37 = vpop.f32.mrb[11].mxu1 }
 0xb8b   :  { %2274 = vtanh.f32 %v1106_v36 }
 0xb90   :  { %v1201_v38 = vpop.f32.mrb[12].mxu1 }
 0xb91   :  { %v1206_v40 = vrot.slane %v1201_v38, 4  ;;  %v1994_v42 = vpop.f32.mrb[13].mxu1 }
 0xb93   :  { %v1208_v43 = vadd.f32 %v1206_v40, %v2607_v20 }
 0xb95   :  { %v2275_v11 = vpop.eup %2274  ;;  %2276 = vtanh.f32 %v1208_v43 }
 0xb96   :  { %v1110_v45 = vadd.f32 1.0, %v2275_v11 }
 0xb98   :  { %v1111_v46 = vmul.f32 0.5, %v1110_v45 }
 0xb9a   :  { %v1112_v47 = vsel %vm2611_vm14, %v2275_v11, %v1111_v46 }
 0xb9b   :  { %1115 = vrot.lane.b32.xlu1 %v1112_v47, %s2398_s28  ;;  %v1113_v56 = vmul.f32 %v1112_v47, %v918_v15 }
 0xb9f   :  { %v2277_v16 = vpop.eup %2276 }
 0xba0   :  { %v1210_v49 = vadd.f32 1.0, %v2277_v16 }
 0xba2   :  { %v1211_v50 = vmul.f32 0.5, %v1210_v49 }
 0xba4   :  { %v1212_v51 = vsel %vm2611_vm14, %v2277_v16, %v1211_v50 }
 0xba5   :  { %1218 = vrot.lane.b32.xlu0 %v1212_v51, %s2398_s28  ;;  %v1216_v60 = vmul.f32 %v1214_v59, %v1212_v51 }
 0xc0d   :  { %v1116_v52 = vpop.permute.xlu1 %1115 }
 0xc0e   :  { %v1118_v2 = vmul.f32 %v1116_v52, %v1112_v47 }
 0xc10   :  { %1120 = vrot.lane.b32.xlu1 %v1118_v2, %s2401_s7 }
 0xc17   :  { %v1219_v54 = vpop.permute.xlu0 %1218 }
 0xc18   :  { %v1221_v55 = vmul.f32 %v1219_v54, %v1212_v51 }
 0xc1a   :  { %1223 = vrot.lane.b32.xlu0 %v1221_v55, %s2401_s7 }
 0xc82   :  { %v1121_v57 = vpop.permute.xlu1 %1120 }
 0xc83   :  { %v1123_v58 = vadd.f32 %v1121_v57, %v1113_v56 }
 0xc85   :  { %2278 = vtanh.f32 %v1123_v58 }
 0xc8c   :  { %v1224_v61 = vpop.permute.xlu0 %1223 }
 0xc8d   :  { %v1226_v62 = vadd.f32 %v1224_v61, %v1216_v60 }
 0xc8f   :  { %v2279_v63 = vpop.eup %2278  ;;  %2280 = vtanh.f32 %v1226_v62  ;;  %v1422_v33 = vrot.slane %v1226_v62, 6 }
 0xc90   :  { %1126 = vrot.lane.b32.xlu1 %v2279_v63, %s2398_s28 }
 0xc99   :  { %v2281_v1 = vpop.eup %2280 }
 0xc9a   :  { %1229 = vrot.lane.b32.xlu0 %v2281_v1, %s2398_s28 }
 0xd02   :  { %v1127_v3 = vpop.permute.xlu1 %1126 }
 0xd03   :  { %v1129_v4 = vmul.f32 %v1127_v3, %v1112_v47  ;;  %v1546_v3 = vld [vmem:[#allocation5 + $0x10] sm:$0xff] }
 0xd05   :  { %v1238_v5 = vrot.slane %v1129_v4, 4  ;;  %v1548_v4 = vld [vmem:[#allocation5 + $0x20] sm:$0xff] }
 0xd07   :  { %1239 = vrot.lane.b32.xlu0 %v1238_v5, %s2398_s28 }
 0xd0c   :  { %v1230_v6 = vpop.permute.xlu0 %1229 }
 0xd0d   :  { %v1232_v7 = vmul.f32 %v1230_v6, %v1212_v51  ;;  %v1549_v6 = vld [vmem:[#allocation5 + $0x28] sm:$0xff] }
 0xd0f   :  { %1234 = vrot.lane.b32.xlu1 %v1232_v7, %s2401_s7  ;;  %v1338_v8 = vrot.slane %v1232_v7, 4  ;;  %v2227_v7 = vpack.c.bf16 %v1549_v6, %v1548_v4 }
 0xd13   :  { %1339 = vrot.lane.b32.xlu1 %v1338_v8, %s2401_s7 }
 0xd79   :  { %v1240_v9 = vpop.permute.xlu0 %1239 }
 0xd81   :  { %v1235_v10 = vpop.permute.xlu1 %1234 }
 0xd82   :  { %v1242_v12 = vsel %vm308_vm8, %v1235_v10, %v1240_v9  ;;  %v1631_v10 = vld [vmem:[#allocation2 + $0x1a0] sm:$0xff] }
 0xd83   :  { %v1244_v13 = vrot.slane %v1242_v12, 4  ;;  %v1632_v12 = vld [vmem:[#allocation2 + $0x1a8] sm:$0xff] }
 0xd85   :  { %v1340_v14 = vpop.permute.xlu1 %1339  ;;  %2012 = vmatmul.mubr.msk.f32.vlgmr.msra.gmra.mrb[10].mxu0 %vm453_vm9, %v1244_v13  ;;  %v2230_v13 = vpack.c.bf16 %v1632_v12, %v1631_v10 }
 0xd86   :  { %2023 = vmatmul.mubr.msk.f32.vlgmr.msra.gmra.mrb[14].mxu1 %vm308_vm8, %v1340_v14  ;;  %2052 = vmatprep.mubr.msk.f32.mxu0 %vm2399_vm10, %v2400_v29  ;;  %v1633_v14 = vld [vmem:[#allocation2 + $0x1b0] sm:$0xff] }
 0xd87   :  { %2213 = vmatpush3.bf16.msra.mxu1 %v2622_v39  ;;  %2041 = vmatprep.mubr.msk.f32.mxu1 %vm2399_vm10, %v2400_v29 }
 0xd88   :  { %2214 = vmatprep.subr.bf16.mxu1 %v2397_v35 }
 0xd8b   :  { %2216 = vmatpush3.bf16.msra.mxu1 %v2625_v41 }
 0xd8c   :  { %2217 = vmatprep.subr.bf16.mxu1 %v2397_v35 }
 0xd8f   :  { %2219 = vmatpush3.bf16.msra.mxu1 %v2629_v44 }
 0xd90   :  { %2220 = vmatprep.subr.bf16.mxu1 %v2397_v35 }
 0xd93   :  { %2222 = vmatpush3.bf16.msra.mxu1 %v2634_v48 }
 0xe58   :  { %v1313_v15 = vpop.f32.mrb[10].mxu0 }
 0xe59   :  { %v1314_v17 = vadd.f32 %v2663_v53, %v1313_v15  ;;  %v2013_v18 = vpop.f32.mrb[11].mxu0  ;;  %v1409_v39 = vpop.f32.mrb[14].mxu1  ;;  %v1634_v15 = vld [vmem:[#allocation2 + $0x1b8] sm:$0xff] }
 0xe5a   :  { %v1414_v19 = vrot.slane %v1409_v39, 2  ;;  %v2024_v21 = vpop.f32.mrb[15].mxu1  ;;  %v2233_v18 = vpack.c.bf16 %v1634_v15, %v1633_v14  ;;  %v1635_v39 = vld [vmem:[#allocation2 + $0x1c0] sm:$0xff] }
 0xe5b   :  { %2282 = vtanh.f32 %v1314_v17 }
 0xe5c   :  { %v1416_v22 = vadd.f32 %v1414_v19, %v2607_v20  ;;  %v1636_v19 = vld [vmem:[#allocation2 + $0x1c8] sm:$0xff] }
 0xe5d   :  { %v2236_v21 = vpack.c.bf16 %v1636_v19, %v1635_v39 }
 0xe5e   :  { %2284 = vtanh.f32 %v1416_v22  ;;  %v1637_v22 = vld [vmem:[#allocation2 + $0x1d0] sm:$0xff] }
 0xe65   :  { %v2283_v41 = vpop.eup %2282 }
 0xe66   :  { %v1318_v23 = vadd.f32 1.0, %v2283_v41 }
 0xe68   :  { %v2285_v24 = vpop.eup %2284  ;;  %v1319_v25 = vmul.f32 0.5, %v1318_v23 }
 0xe69   :  { %v1418_v44 = vadd.f32 1.0, %v2285_v24 }
 0xe6a   :  { %v1320_v26 = vsel %vm2611_vm14, %v2283_v41, %v1319_v25  ;;  %v1638_v41 = vld [vmem:[#allocation2 + $0x1d8] sm:$0xff] }
 0xe6b   :  { %1323 = vrot.lane.b32.xlu0 %v1320_v26, %s2398_s28  ;;  %v1419_v48 = vmul.f32 0.5, %v1418_v44  ;;  %v1321_v0 = vmul.f32 %v1320_v26, %v1123_v58  ;;  %v2239_v23 = vpack.c.bf16 %v1638_v41, %v1637_v22 }
 0xe6d   :  { %v1420_v28 = vsel %vm2611_vm14, %v2285_v24, %v1419_v48  ;;  %v1755_v24 = vld [vmem:[#allocation7 + $0x4] ss:$0 sm:$0xff]  ;;  %v1757_v48 = vld [vmem:[#allocation7 + $0x5] ss:$0 sm:$0xff] }
 0xe6e   :  { %1426 = vrot.lane.b32.xlu1 %v1420_v28, %s2398_s28  ;;  %v1424_v37 = vmul.f32 %v1422_v33, %v1420_v28 }
 0xedd   :  { %v1324_v30 = vpop.permute.xlu0 %1323 }
 0xede   :  { %v1326_v31 = vmul.f32 %v1324_v30, %v1320_v26 }
 0xee0   :  { %1328 = vrot.lane.b32.xlu0 %v1326_v31, %s2401_s7  ;;  %v1427_v20 = vpop.permute.xlu1 %1426 }
 0xee1   :  { %v1429_v32 = vmul.f32 %v1427_v20, %v1420_v28 }
 0xee3   :  { %1431 = vrot.lane.b32.xlu1 %v1429_v32, %s2401_s7 }
 0xf52   :  { %v1329_v34 = vpop.permute.xlu0 %1328 }
 0xf53   :  { %v1331_v36 = vadd.f32 %v1329_v34, %v1321_v0 }
 0xf55   :  { %2286 = vtanh.f32 %v1331_v36  ;;  %v1432_v38 = vpop.permute.xlu1 %1431 }
 0xf56   :  { %v1434_v40 = vadd.f32 %v1432_v38, %v1424_v37 }
 0xf58   :  { %2288 = vtanh.f32 %v1434_v40 }
 0xf5f   :  { %v2287_v42 = vpop.eup %2286 }
 0xf60   :  { %1334 = vrot.lane.b32.xlu0 %v2287_v42, %s2398_s28 }
 0xf62   :  { %v2289_v43 = vpop.eup %2288 }
 0xf63   :  { %1437 = vrot.lane.b32.xlu1 %v2289_v43, %s2398_s28 }
 0xfd2   :  { %v1335_v11 = vpop.permute.xlu0 %1334 }
 0xfd3   :  { %v1337_v45 = vmul.f32 %v1335_v11, %v1320_v26 }
 0xfd5   :  { %v1446_v46 = vrot.slane %v1337_v45, 2  ;;  %v1438_v47 = vpop.permute.xlu1 %1437 }
 0xfd6   :  { %v1440_v16 = vmul.f32 %v1438_v47, %v1420_v28 }
 0xfd7   :  { %1447 = vrot.lane.b32.xlu1 %v1446_v46, %s2398_s28 }
 0xfd8   :  { %1442 = vrot.lane.b32.xlu0 %v1440_v16, %s2401_s7 }
0x1049   :  { %v1448_v49 = vpop.permute.xlu1 %1447 }
0x104a   :  { %v1443_v50 = vpop.permute.xlu0 %1442 }
0x104b   :  { %v1450_v51 = vsel %vm308_vm8, %v1443_v50, %v1448_v49 }
0x104c   :  { %v1452_v52 = vrot.slane %v1450_v51, 6 }
0x104e   :  { %2042 = vmatmul.mubr.msk.f32.vlgmr.msra.gmra.mrb[16].mxu1 %vm453_vm9, %v1452_v52 }
0x1121   :  { %v1521_v2 = vpop.f32.mrb[16].mxu1 }
0x1122   :  { %v1522_v54 = vadd.f32 %v2663_v53, %v1521_v2  ;;  %v2043_v55 = vpop.f32.mrb[17].mxu1  ;;  %v1547_v53 = vld [vmem:[#allocation5 + $0x18] sm:$0xff] }
0x1123   :  { %v2224_v5 = vpack.c.bf16 %v1547_v53, %v1546_v3 }
0x1124   :  { %2290 = vtanh.f32 %v1522_v54 }
0x1125   :  { %2225 = vmatpush3.bf16.msra.mxu0 %v2224_v5 }
0x1126   :  { %2226 = vmatprep.subr.bf16.mxu0 %v2397_v35 }
0x1129   :  { %2228 = vmatpush3.bf16.msra.mxu0 %v2227_v7 }
0x112a   :  { %2229 = vmatprep.subr.bf16.mxu0 %v2397_v35 }
0x112e   :  { %v2291_v56 = vpop.eup %2290 }
0x112f   :  { %v1526_v57 = vadd.f32 1.0, %v2291_v56 }
0x1131   :  { %v1527_v58 = vmul.f32 0.5, %v1526_v57 }
0x1133   :  { %v1528_v59 = vsel %vm2611_vm14, %v2291_v56, %v1527_v58 }
0x1134   :  { %1531 = vrot.lane.b32.xlu0 %v1528_v59, %s2398_s28  ;;  %v1529_v62 = vmul.f32 %v1528_v59, %v1331_v36 }
0x11a6   :  { %v1532_v60 = vpop.permute.xlu0 %1531 }
0x11a7   :  { %v1534_v61 = vmul.f32 %v1532_v60, %v1528_v59 }
0x11a9   :  { %1536 = vrot.lane.b32.xlu1 %v1534_v61, %s2401_s7 }
0x121b   :  { %v1537_v63 = vpop.permute.xlu1 %1536 }
0x121c   :  { %v1539_v1 = vadd.f32 %v1537_v63, %v1529_v62 }
0x121e   :  { %2292 = vtanh.f32 %v1539_v1 }
0x1228   :  { %v2293_v27 = vpop.eup %2292 }
0x1229   :  { %1542 = vrot.lane.b32.xlu0 %v2293_v27, %s2398_s28 }
0x129b   :  { %v1543_v8 = vpop.permute.xlu0 %1542 }
0x129c   :  { %v1545_v9 = vmul.f32 %v1543_v8, %v1528_v59 }
0x129e   :  { %1556 = vrot.lane.b32.xlu1 %v1545_v9, %s2401_s7 }
0x1310   :  { %v1557_v17 = vpop.permute.xlu1 %1556 }
0x1311   :  { %2053 = vmatmul.mubr.msk.f32.vlgmr.msra.gmra.mrb[12].mxu0 %vm308_vm8, %v1557_v17 }
0x1312   :  { %2231 = vmatpush3.bf16.msra.mxu0 %v2230_v13  ;;  %2071 = vmatprep.mubr.msk.f32.mxu0 %vm2399_vm10, %v2400_v29 }
0x1313   :  { %2232 = vmatprep.subr.bf16.mxu0 %v2397_v35 }
0x1316   :  { %2234 = vmatpush3.bf16.msra.mxu0 %v2233_v18 }
0x1317   :  { %2235 = vmatprep.subr.bf16.mxu0 %v2397_v35 }
0x131a   :  { %2237 = vmatpush3.bf16.msra.mxu0 %v2236_v21 }
0x131b   :  { %2238 = vmatprep.subr.bf16.mxu0 %v2397_v35 }
0x131e   :  { %2240 = vmatpush3.bf16.msra.mxu0 %v2239_v23 }
0x13e4   :  { %v1626_v25 = vpop.f32.mrb[12].mxu0 }
0x13e5   :  { %v1627_v44 = vadd.f32 %v1755_v24, %v1626_v25  ;;  %v2054_v26 = vpop.f32.mrb[13].mxu0 }
0x13e7   :  { %v1630_v29 = vmax.f32 %v1627_v44, 0.0 }
0x13e9   :  { %2072 = vmatmul.mubr.msk.f32.vlgmr.msra.gmra.mrb[14].mxu0 %vm453_vm9, %v1630_v29 }
0x14bc   :  { %v1713_v28 = vpop.f32.mrb[14].mxu0 }
0x14bd   :  { %v1714_v30 = vadd.f32 %v1757_v48, %v1713_v28  ;;  %v2073_v31 = vpop.f32.mrb[15].mxu0 }
0x14bf   :  { %1717 = vst [vmem:[#allocation8] sm:$0x3] %v1714_v30 }
0x14c0   :  { %2371 = shalt.err (!%p2368_p0)
}
0x14c1   :  { %s2372_s2 = scalar_lea.hbm %s2777_s4, 32 }
0x14c2   :  { %p2373_p1 = scmp.ne.s32.totalorder %s2777_s4, %s2372_s2  ;;  %p2376_p2 = scmp.lt.u32.totalorder %s2372_s2, %s2777_s4 }
0x14c4   :  { %p2378_p3 = pnand %p2376_p2, %p2373_p1 }
0x14c6   :  { %2381 = shalt.err (!%p2378_p3)
}
0x14c7   :  { %1727 = dma.vmem_to_hbm [thread:$0]  %s1725_s9, 32, %s2777_s4, [#allocation4]  }
0x14c8   :  { %2386 = dma.done.wait [#allocation4], 32  }
0x14c9   :  { %2387 = vsyncadd [#allocation4], 4294967264 }
0x14ca   :  { %1731 = vsyncpa [#allocation3], 1 }
0x14cb   :  { %1732 = vsyncpa [#allocation6], 1 }
0x14cc   :  { %1733 = vsyncpa [#allocation4], 1 }

</bundles_post_ra>
